<compile_context>
chip_gen: v7x
topology: tpu7x:2x2x1
jax: 0.10.0
libtpu: 0.0.40
codegen_flags: <defaults>
</compile_context>

<pallas_src>
import jax
import jax.numpy as jnp
from jax.experimental import pallas as pl
from jax.experimental.pallas import tpu as pltpu


def fused_add_conv1x1_bn_kernel(x1_ref, x2_ref, w_ref, gb_ref, o_ref):
    eps = 1e-5

    # bf16 loads (halved HBM traffic); promote to f32 immediately for all math
    # (v5e has no bf16 VALU; compute is far from the bottleneck here).
    s = x1_ref[...].astype(jnp.float32) + x2_ref[...].astype(jnp.float32)
    w = w_ref[...].astype(jnp.float32)                         # [Tc, Cin]

    # 1x1 conv == matmul on the MXU: [Tc, Cin] @ [Cin, P] -> [Tc, P], f32 acc.
    y = jnp.dot(w, s, preferred_element_type=jnp.float32)      # [Tc, P]

    # BatchNorm2d training-mode batch statistics (biased variance), two-pass
    # (centered) form for numerical robustness.
    inv_p = 1.0 / y.shape[1]
    mean = jnp.sum(y, axis=1, keepdims=True) * inv_p           # [Tc, 1]
    d = y - mean                                               # [Tc, P]
    var = jnp.sum(d * d, axis=1, keepdims=True) * inv_p        # [Tc, 1]

    gamma = gb_ref[:, 0:1]                                     # [Tc, 1] f32
    beta = gb_ref[:, 1:2]                                      # [Tc, 1] f32
    scale = gamma * jax.lax.rsqrt(var + eps)                   # [Tc, 1]

    # (y - mean) * scale + beta  ==  BN(y); reuses d, no extra sweep over y.
    o_ref[...] = (d * scale + beta).astype(o_ref.dtype)


def fused_forward(x148, x133, w, gamma, beta):
    """
    x148, x133 : [N=1, Cin, H, W]   (any float dtype; cast to bf16 for the DMA)
    w          : [Cout, Cin]        (torch Conv2d weight [Cout,Cin,1,1] squeezed)
    gamma,beta : [Cout]             (BatchNorm2d affine params)
    returns    : [N, Cout, H, W] float32
    """
    N, Cin, H, W = x148.shape
    Cout = w.shape[0]
    assert N == 1, "channel-major [C, H*W] fast path relies on batch == 1"
    P = H * W

    # Two Cout tiles when possible (pipelining + v7x megacore), else one.
    if Cout % 2 == 0 and (Cout // 2) % 8 == 0:
        tile_cout = Cout // 2
    else:
        tile_cout = Cout
    n_tiles = Cout // tile_cout

    # NCHW with N == 1 is already channel-major: free reshapes, no transpose.
    # bf16 casts halve the kernel-side HBM bytes (in a real pipeline the
    # producers would emit bf16 directly).
    x1 = x148.reshape(Cin, P).astype(jnp.bfloat16)
    x2 = x133.reshape(Cin, P).astype(jnp.bfloat16)
    wb = w.astype(jnp.bfloat16)

    # Pack gamma/beta into a single per-channel array: one DMA, one buffer.
    gb = jnp.stack([gamma.astype(jnp.float32),
                    beta.astype(jnp.float32)], axis=1)          # [Cout, 2]

    cost = pl.CostEstimate(
        flops=2 * P * Cin * Cout,
        transcendentals=0,
        bytes_accessed=(2 * Cin * P + Cout * Cin) * 2   # bf16 inputs + weight
        + Cout * 2 * 4                                  # gamma/beta
        + Cout * P * 4,                                 # f32 output
    )

    out_mat = pl.pallas_call(
        fused_add_conv1x1_bn_kernel,
        out_shape=jax.ShapeDtypeStruct((Cout, P), jnp.float32),
        grid=(n_tiles,),
        in_specs=[
            pl.BlockSpec((Cin, P), lambda i: (0, 0)),           # x1 (full)
            pl.BlockSpec((Cin, P), lambda i: (0, 0)),           # x2 (full)
            pl.BlockSpec((tile_cout, Cin), lambda i: (i, 0)),   # weight tile
            pl.BlockSpec((tile_cout, 2), lambda i: (i, 0)),     # gamma/beta
        ],
        out_specs=pl.BlockSpec((tile_cout, P), lambda i: (i, 0)),
        compiler_params=pltpu.CompilerParams(
            dimension_semantics=("parallel",)),
        cost_estimate=cost,
    )(x1, x2, wb, gb)

    # [Cout, P] is exactly NCHW memory order for N == 1: free reshape back.
    return out_mat.reshape(N, Cout, H, W)


if __name__ == "__main__":
    N, Cin, H, W = 1, 96, 14, 14
    Cout = 576

    key = jax.random.PRNGKey(0)
    k1, k2, k3 = jax.random.split(key, 3)

    x148 = jax.random.normal(k1, (N, Cin, H, W), dtype=jnp.float32)
    x133 = jax.random.normal(k2, (N, Cin, H, W), dtype=jnp.float32)

    # Conv2d(96, 576, 1x1, bias=False): torch weight [576, 96, 1, 1], squeezed.
    w_torch = jax.random.normal(k3, (Cout, Cin, 1, 1), dtype=jnp.float32) * (
        1.0 / jnp.sqrt(Cin))
    w = w_torch.reshape(Cout, Cin)

    # BatchNorm2d default init: weight (gamma) = 1, bias (beta) = 0.
    gamma = jnp.ones((Cout,), dtype=jnp.float32)
    beta = jnp.zeros((Cout,), dtype=jnp.float32)

    # TODO(synk): BatchNorm running_mean/running_var (and num_batches_tracked)
    # training-mode buffer updates are not emitted; they do not affect the
    # returned tensor.
    out = fused_forward(x148, x133, w, gamma, beta)
    out = jax.block_until_ready(out)
    assert out.shape == (N, Cout, H, W)
    assert bool(jnp.all(jnp.isfinite(out)))
    print("KERNEL_OK")
</pallas_src>

<mosaic_0001>
module attributes {stable_mosaic.version = 11 : i64} {
  func.func @fused_add_conv1x1_bn_kernel(%arg0: i32, %arg1: memref<96x196xbf16, #tpu.memory_space<vmem>>, %arg2: memref<96x196xbf16, #tpu.memory_space<vmem>>, %arg3: memref<288x96xbf16, #tpu.memory_space<vmem>>, %arg4: memref<288x2xf32, #tpu.memory_space<vmem>>, %arg5: memref<288x196xf32, #tpu.memory_space<vmem>>) attributes {dimension_semantics = [#tpu.dimension_semantics<parallel>], iteration_bounds = array<i64: 2>, scalar_prefetch = 0 : i64, scratch_operands = 0 : i64, tpu.core_type = #tpu.core_type<tc>, window_params = [{pipeline_mode = #tpu.pipeline_mode<synchronous>, transform_indices = @transform_0, window_bounds = array<i64: 96, 196>}, {pipeline_mode = #tpu.pipeline_mode<synchronous>, transform_indices = @transform_1, window_bounds = array<i64: 96, 196>}, {transform_indices = @transform_2, window_bounds = array<i64: 288, 96>}, {transform_indices = @transform_3, window_bounds = array<i64: 288, 2>}, {transform_indices = @transform_4, window_bounds = array<i64: 288, 196>}]} {
    %c0 = arith.constant 0 : index
    %c0_0 = arith.constant 0 : index
    %0 = vector.load %arg1[%c0, %c0_0] : memref<96x196xbf16, #tpu.memory_space<vmem>>, vector<96x196xbf16>
    %1 = arith.extf %0 : vector<96x196xbf16> to vector<96x196xf32>
    %c0_1 = arith.constant 0 : index
    %c0_2 = arith.constant 0 : index
    %2 = vector.load %arg2[%c0_1, %c0_2] : memref<96x196xbf16, #tpu.memory_space<vmem>>, vector<96x196xbf16>
    %3 = arith.extf %2 : vector<96x196xbf16> to vector<96x196xf32>
    %4 = arith.addf %1, %3 : vector<96x196xf32>
    %c0_3 = arith.constant 0 : index
    %c0_4 = arith.constant 0 : index
    %5 = vector.load %arg3[%c0_3, %c0_4] : memref<288x96xbf16, #tpu.memory_space<vmem>>, vector<288x96xbf16>
    %6 = arith.extf %5 : vector<288x96xbf16> to vector<288x96xf32>
    %cst = arith.constant dense<0.000000e+00> : vector<288x196xf32>
    %7 = tpu.matmul %6, %4, %cst {dimension_numbers = #tpu.dot_dimension_numbers<[1], [0], [0], [1], [0, 0, 1, 1], [], []>} : vector<288x96xf32>, vector<96x196xf32>, vector<288x196xf32> -> vector<288x196xf32>
    %cst_5 = arith.constant dense<0.000000e+00> : vector<288xf32>
    %8 = vector.multi_reduction <add>, %7, %cst_5 [1] : vector<288x196xf32> to vector<288xf32>
    %9 = vector.shape_cast %8 : vector<288xf32> to vector<288x1xf32>
    %cst_6 = arith.constant 0.00510204071 : f32
    %10 = vector.broadcast %cst_6 : f32 to vector<288x1xf32>
    %11 = arith.mulf %9, %10 : vector<288x1xf32>
    %12 = vector.broadcast %11 : vector<288x1xf32> to vector<288x196xf32>
    %13 = arith.subf %7, %12 : vector<288x196xf32>
    %14 = arith.mulf %13, %13 : vector<288x196xf32>
    %cst_7 = arith.constant dense<0.000000e+00> : vector<288xf32>
    %15 = vector.multi_reduction <add>, %14, %cst_7 [1] : vector<288x196xf32> to vector<288xf32>
    %16 = vector.shape_cast %15 : vector<288xf32> to vector<288x1xf32>
    %cst_8 = arith.constant 0.00510204071 : f32
    %17 = vector.broadcast %cst_8 : f32 to vector<288x1xf32>
    %18 = arith.mulf %16, %17 : vector<288x1xf32>
    %c0_9 = arith.constant 0 : index
    %c0_10 = arith.constant 0 : index
    %19 = vector.load %arg4[%c0_9, %c0_10] : memref<288x2xf32, #tpu.memory_space<vmem>>, vector<288x1xf32>
    %c0_11 = arith.constant 0 : index
    %c1 = arith.constant 1 : index
    %20 = vector.load %arg4[%c0_11, %c1] : memref<288x2xf32, #tpu.memory_space<vmem>>, vector<288x1xf32>
    %cst_12 = arith.constant 9.99999974E-6 : f32
    %21 = vector.broadcast %cst_12 : f32 to vector<288x1xf32>
    %22 = arith.addf %18, %21 : vector<288x1xf32>
    %23 = math.rsqrt %22 : vector<288x1xf32>
    %24 = arith.mulf %19, %23 : vector<288x1xf32>
    %25 = vector.broadcast %24 : vector<288x1xf32> to vector<288x196xf32>
    %26 = arith.mulf %13, %25 : vector<288x196xf32>
    %27 = vector.broadcast %20 : vector<288x1xf32> to vector<288x196xf32>
    %28 = arith.addf %26, %27 : vector<288x196xf32>
    %c0_13 = arith.constant 0 : index
    %c0_14 = arith.constant 0 : index
    %29 = vector.load %arg5[%c0_13, %c0_14] : memref<288x196xf32, #tpu.memory_space<vmem>>, vector<288x196xf32>
    tpu.vector_store %arg5[%c0_13, %c0_14], %28 {strides = array<i32>} : memref<288x196xf32, #tpu.memory_space<vmem>>, vector<288x196xf32>,
    return
  }
  func.func @transform_0(%arg0: i32) -> (i32, i32) {
    %c0_i32 = arith.constant 0 : i32
    %c0_i32_0 = arith.constant 0 : i32
    %c0_i32_1 = arith.constant 0 : i32
    return %c0_i32, %c0_i32_0 : i32, i32
  }
  func.func @transform_1(%arg0: i32) -> (i32, i32) {
    %c0_i32 = arith.constant 0 : i32
    %c0_i32_0 = arith.constant 0 : i32
    %c0_i32_1 = arith.constant 0 : i32
    return %c0_i32, %c0_i32_0 : i32, i32
  }
  func.func @transform_2(%arg0: i32) -> (i32, i32) {
    %c0_i32 = arith.constant 0 : i32
    %c0_i32_0 = arith.constant 0 : i32
    return %arg0, %c0_i32 : i32, i32
  }
  func.func @transform_3(%arg0: i32) -> (i32, i32) {
    %c0_i32 = arith.constant 0 : i32
    %c0_i32_0 = arith.constant 0 : i32
    return %arg0, %c0_i32 : i32, i32
  }
  func.func @transform_4(%arg0: i32) -> (i32, i32) {
    %c0_i32 = arith.constant 0 : i32
    %c0_i32_0 = arith.constant 0 : i32
    return %arg0, %c0_i32 : i32, i32
  }
}

</mosaic_0001>

<bundles_post_ra>
// kernel: tpu_custom_call.1
= control target key start
LH: loop header
LB: loop body
LE: loop exit
PB: predicated region body
PF: predicated region fallthrough
CT: control target
= control target key end

     0   :  { %s2410_s15 = smov 0   ;;  %s3649_s0 = inlined_call_operand.vmem [shape: bf16[96,196], index: 0, kind: input, shape index: {}]   ;;  %s3650_s1 = inlined_call_operand.vmem [shape: bf16[96,196], index: 1, kind: input, shape index: {}]   ;;  %s3651_s2 = inlined_call_operand.vmem [shape: bf16[576,96], index: 2, kind: input, shape index: {}]   ;;  %s3652_s3 = inlined_call_operand.vmem [shape: f32[576,2], index: 3, kind: input, shape index: {}]   ;;  %s3653_s4 = inlined_call_operand.vmem [shape: f32[576,196], index: 4, kind: output, shape index: {}]  }
   0x1 LB: > { %s2078_s16 = sadd.s32 4294967295, %s2380_s15   ;;  %p2082_p0 = scmp.ge.s32.totalorder %s2380_s15, 1  ;;  %s2380_s15 = sphi %s2410_s15, %s14_s15  }
   0x2   : > { %p174_p1 = scmp.lt.s32.totalorder %s2380_s15, 3 }
   0x4   : > { %p175_p2 = pnand %p2082_p0, %p174_p1 }
   0x6   : > { %178 = sbr.rel (%p175_p2) target bundleno = 828 (0x33c), region = 36 }
   0xd   : > { %v225_v0 = vld [vmem:[%s3649_s0] sm:$0xff]  ;;  %v226_v1 = vld [vmem:[%s3649_s0 + $0x8] sm:$0xff]  ;;  %v227_v8 = vld [vmem:[%s3649_s0 + $0x10] sm:$0xff]  ;;  %v2382_v10 = vmov 0.0   ;;  %s2464_s21 = smul.u32 36, %s2078_s16  ;;  %vm393_vm0 = vcmask 785408  }
   0xe   : > { %v261_v2 = vld [vmem:[%s3650_s1] sm:$0xff]  ;;  %v238_v3 = vunpack.c.h.bf16 %v225_v0  ;;  %v240_v4 = vunpack.c.h.bf16 %v226_v1  ;;  %v262_v5 = vld [vmem:[%s3650_s1 + $0x8] sm:$0xff]  ;;  %v237_v7 = vunpack.c.l.bf16 %v225_v0  ;;  %v228_v9 = vld [vmem:[%s3649_s0 + $0x18] sm:$0xff]  ;;  %566 = vmatprep.mubr.f32.mxu0 %v2382_v10  ;;  %674 = vmatprep.mubr.f32.mxu1 %v2382_v10  ;;  %v239_v12 = vunpack.c.l.bf16 %v226_v1 }
   0xf   : > { %v274_v6 = vunpack.c.h.bf16 %v261_v2  ;;  %v276_v11 = vunpack.c.h.bf16 %v262_v5  ;;  %v273_v13 = vunpack.c.l.bf16 %v261_v2  ;;  %v275_v14 = vunpack.c.l.bf16 %v262_v5  ;;  %v263_v15 = vld [vmem:[%s3650_s1 + $0x10] sm:$0xff]  ;;  %v264_v16 = vld [vmem:[%s3650_s1 + $0x18] sm:$0xff]  ;;  %v229_v25 = vld [vmem:[%s3649_s0 + $0x20] sm:$0xff]  ;;  %p207_p3 = scmp.lt.s32.totalorder %s2464_s21, 71 }
  0x10   : > { %v242_v18 = vunpack.c.h.bf16 %v227_v8  ;;  %v244_v19 = vunpack.c.h.bf16 %v228_v9  ;;  %v278_v20 = vunpack.c.h.bf16 %v263_v15  ;;  %v280_v24 = vunpack.c.h.bf16 %v264_v16  ;;  %v230_v26 = vld [vmem:[%s3649_s0 + $0x28] sm:$0xff]  ;;  %v265_v27 = vld [vmem:[%s3650_s1 + $0x20] sm:$0xff]  ;;  %v231_v41 = vld [vmem:[%s3649_s0 + $0x30] sm:$0xff] }
  0x11   : > { %v298_v17 = vadd.f32 %v274_v6, %v238_v3  ;;  %v300_v21 = vadd.f32 %v276_v11, %v240_v4  ;;  %v297_v22 = vadd.f32 %v273_v13, %v237_v7  ;;  %v299_v23 = vadd.f32 %v275_v14, %v239_v12  ;;  %v266_v32 = vld [vmem:[%s3650_s1 + $0x28] sm:$0xff]  ;;  %v232_v42 = vld [vmem:[%s3649_s0 + $0x38] sm:$0xff]  ;;  %v267_v47 = vld [vmem:[%s3650_s1 + $0x30] sm:$0xff]  ;;  %s3922_s21 = smov (!%p207_p3, %s2464_s21), 71 }
  0x12   : > { %v302_v28 = vadd.f32 %v278_v20, %v242_v18  ;;  %v241_v29 = vunpack.c.l.bf16 %v227_v8  ;;  %v243_v30 = vunpack.c.l.bf16 %v228_v9  ;;  %v277_v31 = vunpack.c.l.bf16 %v263_v15  ;;  %v268_v48 = vld [vmem:[%s3650_s1 + $0x38] sm:$0xff]  ;;  %v233_v61 = vld [vmem:[%s3649_s0 + $0x40] sm:$0xff]  ;;  %v234_v62 = vld [vmem:[%s3649_s0 + $0x48] sm:$0xff]  ;;  %s2083_s17 = sshll.u32 %s3922_s21, 2  ;;  %s2084_s22 = sshll.u32 %s3922_s21, 3 }
  0x13   : > { %v2215_v33 = vpack.c.bf16 %v300_v21, %v298_v17  ;;  %v2217_v34 = vpack.c.bf16 %v299_v23, %v297_v22  ;;  %v304_v35 = vadd.f32 %v280_v24, %v244_v19  ;;  %v279_v36 = vunpack.c.l.bf16 %v264_v16  ;;  %v269_v63 = vld [vmem:[%s3650_s1 + $0x40] sm:$0xff]  ;;  %v270_v4 = vld [vmem:[%s3650_s1 + $0x48] sm:$0xff]  ;;  %v235_v14 = vld [vmem:[%s3649_s0 + $0x50] sm:$0xff]  ;;  %s2506_s20 = scalar_lea.vmem %s3651_s2, %s2083_s17  ;;  %s2512_s25 = scalar_lea.vmem %s3652_s3, %s2084_s22 }
  0x14   : > { %v301_v37 = vadd.f32 %v277_v31, %v241_v29  ;;  %v246_v38 = vunpack.c.h.bf16 %v229_v25  ;;  %v248_v39 = vunpack.c.h.bf16 %v230_v26  ;;  %v282_v40 = vunpack.c.h.bf16 %v265_v27  ;;  %v236_v15 = vld [vmem:[%s3649_s0 + $0x58] sm:$0xff]  ;;  %v271_v20 = vld [vmem:[%s3650_s1 + $0x50] sm:$0xff]  ;;  %s2125_s16 = sshll.u32 %s3922_s21, 4 }
  0x15   : > { %2216 = vmatprep.subr.bf16.mxu0 %v2215_v33  ;;  %2239 = vmatprep.subr.bf16.mxu1 %v2215_v33  ;;  %v2219_v43 = vpack.c.bf16 %v304_v35, %v302_v28  ;;  %v303_v44 = vadd.f32 %v279_v36, %v243_v30  ;;  %v284_v45 = vunpack.c.h.bf16 %v266_v32  ;;  %v245_v46 = vunpack.c.l.bf16 %v229_v25  ;;  %v272_v21 = vld [vmem:[%s3650_s1 + $0x58] sm:$0xff]  ;;  %s3398_s28 = scalar_lea.vmem %s3653_s4, %s2125_s16 }
  0x16   : > { %2218 = vmatpush1.bf16.msra.mxu0 %v2217_v34  ;;  %2245 = vmatpush1.bf16.msra.mxu1 %v2217_v34  ;;  %v306_v49 = vadd.f32 %v282_v40, %v246_v38  ;;  %v247_v50 = vunpack.c.l.bf16 %v230_v26  ;;  %v281_v51 = vunpack.c.l.bf16 %v265_v27  ;;  %v283_v52 = vunpack.c.l.bf16 %v266_v32 }
  0x17   : > { %2220 = vmatprep.subr.bf16.mxu0 %v2219_v43  ;;  %2240 = vmatprep.subr.bf16.mxu1 %v2219_v43  ;;  %v2221_v53 = vpack.c.bf16 %v303_v44, %v301_v37  ;;  %v308_v54 = vadd.f32 %v284_v45, %v248_v39  ;;  %v250_v55 = vunpack.c.h.bf16 %v231_v41  ;;  %v252_v56 = vunpack.c.h.bf16 %v232_v42 }
  0x18   : > { %v305_v57 = vadd.f32 %v281_v51, %v245_v46  ;;  %v307_v58 = vadd.f32 %v283_v52, %v247_v50  ;;  %v286_v59 = vunpack.c.h.bf16 %v267_v47  ;;  %v288_v60 = vunpack.c.h.bf16 %v268_v48  ;;  %v2127_v46 = vld [vmem:[%s2506_s20] sm:$0xff]   ;;  %v1289_v51 = vld [vmem:[%s2512_s25 + $0x8] sm:$0xff] }
  0x19   : > { %v2223_v0 = vpack.c.bf16 %v308_v54, %v306_v49  ;;  %v249_v1 = vunpack.c.l.bf16 %v231_v41  ;;  %v251_v2 = vunpack.c.l.bf16 %v232_v42  ;;  %v285_v3 = vunpack.c.l.bf16 %v267_v47  ;;  %v2206_v47 = vld [vmem:[%s2506_s20 + $0x48] sm:$0xff]   ;;  %v1288_v50 = vld [vmem:[%s2512_s25] sm:$0xff] }
  0x1a   : > { %2222 = vmatpush1.bf16.msra.mxu0 %v2221_v53  ;;  %2246 = vmatpush1.bf16.msra.mxu1 %v2221_v53  ;;  %v2225_v5 = vpack.c.bf16 %v307_v58, %v305_v57  ;;  %v310_v6 = vadd.f32 %v286_v59, %v250_v55  ;;  %v312_v7 = vadd.f32 %v288_v60, %v252_v56  ;;  %v287_v8 = vunpack.c.l.bf16 %v268_v48  ;;  %v1290_v55 = vld [vmem:[%s2512_s25 + $0x10] sm:$0xff]  ;;  %v1292_v56 = vld [vmem:[%s2512_s25 + $0x20] sm:$0xff]  ;;  %v2198_v57 = vld [vmem:[%s2506_s20 + $0x8] sm:$0xff]  }
  0x1b   : > { %2224 = vmatprep.subr.bf16.mxu0 %v2223_v0  ;;  %2241 = vmatprep.subr.bf16.mxu1 %v2223_v0  ;;  %v309_v9 = vadd.f32 %v285_v3, %v249_v1  ;;  %v254_v11 = vunpack.c.h.bf16 %v233_v61  ;;  %v256_v12 = vunpack.c.h.bf16 %v234_v62  ;;  %v290_v13 = vunpack.c.h.bf16 %v269_v63  ;;  %v2207_v58 = vld [vmem:[%s2506_s20 + $0x50] sm:$0xff]   ;;  %v1293_v1 = vld [vmem:[%s2512_s25 + $0x28] sm:$0xff] }
  0x1c   : > { %v2227_v16 = vpack.c.bf16 %v312_v7, %v310_v6  ;;  %v311_v17 = vadd.f32 %v287_v8, %v251_v2  ;;  %v292_v18 = vunpack.c.h.bf16 %v270_v4  ;;  %v253_v19 = vunpack.c.l.bf16 %v233_v61  ;;  %v1291_v61 = vld [vmem:[%s2512_s25 + $0x18] sm:$0xff]  ;;  %v1296_v2 = vld [vmem:[%s2512_s25 + $0x40] sm:$0xff]  ;;  %v2199_v3 = vld [vmem:[%s2506_s20 + $0x10] sm:$0xff]  }
  0x1d   : > { %v314_v22 = vadd.f32 %v290_v13, %v254_v11  ;;  %v255_v23 = vunpack.c.l.bf16 %v234_v62  ;;  %v289_v24 = vunpack.c.l.bf16 %v269_v63  ;;  %v291_v25 = vunpack.c.l.bf16 %v270_v4  ;;  %v1294_v62 = vld [vmem:[%s2512_s25 + $0x30] sm:$0xff]  ;;  %v2208_v4 = vld [vmem:[%s2506_s20 + $0x58] sm:$0xff]   ;;  %v1300_v13 = vld [vmem:[%s2512_s25 + $0x60] sm:$0xff] }
  0x1e   : > { %2226 = vmatpush1.bf16.msra.mxu0 %v2225_v5  ;;  %2247 = vmatpush1.bf16.msra.mxu1 %v2225_v5  ;;  %v2229_v26 = vpack.c.bf16 %v311_v17, %v309_v9  ;;  %v316_v27 = vadd.f32 %v292_v18, %v256_v12  ;;  %v258_v28 = vunpack.c.h.bf16 %v235_v14  ;;  %v260_v29 = vunpack.c.h.bf16 %v236_v15  ;;  %v1295_v7 = vld [vmem:[%s2512_s25 + $0x38] sm:$0xff]  ;;  %v1298_v8 = vld [vmem:[%s2512_s25 + $0x50] sm:$0xff]  ;;  %v1297_v12 = vld [vmem:[%s2512_s25 + $0x48] sm:$0xff] }
  0x1f   : > { %2228 = vmatprep.subr.bf16.mxu0 %v2227_v16  ;;  %2242 = vmatprep.subr.bf16.mxu1 %v2227_v16  ;;  %v313_v30 = vadd.f32 %v289_v24, %v253_v19  ;;  %v315_v31 = vadd.f32 %v291_v25, %v255_v23  ;;  %v294_v32 = vunpack.c.h.bf16 %v271_v20  ;;  %v296_v33 = vunpack.c.h.bf16 %v272_v21  ;;  %v1299_v18 = vld [vmem:[%s2512_s25 + $0x58] sm:$0xff]  ;;  %v1302_v19 = vld [vmem:[%s2512_s25 + $0x70] sm:$0xff]  ;;  %v1304_v23 = vld [vmem:[%s2512_s25 + $0x80] sm:$0xff] }
  0x20   : > { %v2231_v34 = vpack.c.bf16 %v316_v27, %v314_v22  ;;  %v257_v35 = vunpack.c.l.bf16 %v235_v14  ;;  %v259_v36 = vunpack.c.l.bf16 %v236_v15  ;;  %v293_v37 = vunpack.c.l.bf16 %v271_v20  ;;  %v2200_v14 = vld [vmem:[%s2506_s20 + $0x18] sm:$0xff]   ;;  %v2209_v15 = vld [vmem:[%s2506_s20 + $0x60] sm:$0xff]   ;;  %v1301_v22 = vld [vmem:[%s2512_s25 + $0x68] sm:$0xff] }
  0x21   : > { %v318_v38 = vadd.f32 %v294_v32, %v258_v28  ;;  %v320_v39 = vadd.f32 %v296_v33, %v260_v29  ;;  %v295_v40 = vunpack.c.l.bf16 %v272_v21  ;;  %v2233_v41 = vpack.c.bf16 %v315_v31, %v313_v30  ;;  %v2201_v24 = vld [vmem:[%s2506_s20 + $0x20] sm:$0xff]   ;;  %v2210_v25 = vld [vmem:[%s2506_s20 + $0x68] sm:$0xff]   ;;  %v1303_v28 = vld [vmem:[%s2512_s25 + $0x78] sm:$0xff] }
  0x22   : > { %2230 = vmatpush1.bf16.msra.mxu0 %v2229_v26  ;;  %2248 = vmatpush1.bf16.msra.mxu1 %v2229_v26  ;;  %v317_v42 = vadd.f32 %v293_v37, %v257_v35  ;;  %v2128_v48 = vunpack.c.l.bf16 %v2127_v46  ;;  %v2164_v49 = vunpack.c.l.bf16 %v2206_v47  ;;  %v3654_v52 = vmov 1   ;;  %v1306_v29 = vld [vmem:[%s2512_s25 + $0x90] sm:$0xff]  ;;  %v1305_v32 = vld [vmem:[%s2512_s25 + $0x88] sm:$0xff]  ;;  %v1308_v33 = vld [vmem:[%s2512_s25 + $0xa0] sm:$0xff] }
  0x23   : > { %2232 = vmatprep.subr.bf16.mxu0 %v2231_v34  ;;  %2243 = vmatprep.subr.bf16.mxu1 %v2231_v34  ;;  %v2235_v43 = vpack.c.bf16 %v320_v39, %v318_v38  ;;  %v319_v44 = vadd.f32 %v295_v40, %v259_v36  ;;  %v2129_v53 = vunpack.c.h.bf16 %v2127_v46  ;;  %v2165_v54 = vunpack.c.h.bf16 %v2206_v47  ;;  %v2202_v34 = vld [vmem:[%s2506_s20 + $0x28] sm:$0xff]   ;;  %v2211_v35 = vld [vmem:[%s2506_s20 + $0x70] sm:$0xff]   ;;  %v1307_v38 = vld [vmem:[%s2512_s25 + $0x98] sm:$0xff] }
  0x24   : > { %2262 = vset.pattern.permute.xlu1 %v3654_v52  ;;  %2263 = vset.pattern.permute.xlu0 %v3654_v52  ;;  %v2132_v59 = vunpack.c.l.bf16 %v2198_v57  ;;  %v2168_v60 = vunpack.c.l.bf16 %v2207_v58  ;;  %v2133_v63 = vunpack.c.h.bf16 %v2198_v57  ;;  %v2169_v0 = vunpack.c.h.bf16 %v2207_v58  ;;  %v1310_v39 = vld [vmem:[%s2512_s25 + $0xb0] sm:$0xff] }
  0x25   : > { %v2237_v45 = vpack.c.bf16 %v319_v44, %v317_v42  ;;  %1686 = vperm.xlu1 %2262, %v1288_v50   ;;  %1691 = vperm.xlu0 %2263, %v1289_v51   ;;  %v2136_v5 = vunpack.c.l.bf16 %v2199_v3  ;;  %v2172_v6 = vunpack.c.l.bf16 %v2208_v4  ;;  %v2137_v9 = vunpack.c.h.bf16 %v2199_v3  ;;  %v1309_v42 = vld [vmem:[%s2512_s25 + $0xa8] sm:$0xff]  ;;  %v2203_v44 = vld [vmem:[%s2506_s20 + $0x30] sm:$0xff]  }
  0x26   : > { %2234 = vmatpush1.bf16.msra.mxu0 %v2233_v41  ;;  %2249 = vmatpush1.bf16.msra.mxu1 %v2233_v41  ;;  %v2173_v11 = vunpack.c.h.bf16 %v2208_v4  ;;  %v2140_v16 = vunpack.c.l.bf16 %v2200_v14  ;;  %v2176_v17 = vunpack.c.l.bf16 %v2209_v15  ;;  %v2141_v20 = vunpack.c.h.bf16 %v2200_v14  ;;  %v1319_v4 = vld [vmem:[%s2512_s25 + $0xf8] sm:$0xff] }
  0x27   : > { %2236 = vmatprep.subr.bf16.mxu0 %v2235_v43  ;;  %2244 = vmatprep.subr.bf16.mxu1 %v2235_v43  ;;  %v2177_v21 = vunpack.c.h.bf16 %v2209_v15  ;;  %v2144_v26 = vunpack.c.l.bf16 %v2201_v24  ;;  %v2180_v27 = vunpack.c.l.bf16 %v2210_v25  ;;  %v2145_v30 = vunpack.c.h.bf16 %v2201_v24  ;;  %v1312_v43 = vld [vmem:[%s2512_s25 + $0xc0] sm:$0xff] }
  0x28   : > { %v2181_v31 = vunpack.c.h.bf16 %v2210_v25  ;;  %v2148_v36 = vunpack.c.l.bf16 %v2202_v34  ;;  %v2184_v37 = vunpack.c.l.bf16 %v2211_v35  ;;  %v2149_v40 = vunpack.c.h.bf16 %v2202_v34 }
  0x29   : > { %1696 = vperm.xlu1 %2262, %v1290_v55   ;;  %1706 = vperm.xlu0 %2263, %v1292_v56   ;;  %v2185_v41 = vunpack.c.h.bf16 %v2211_v35  ;;  %v2152_v46 = vunpack.c.l.bf16 %v2203_v44  ;;  %v2153_v50 = vunpack.c.h.bf16 %v2203_v44  ;;  %v2204_v55 = vld [vmem:[%s2506_s20 + $0x38] sm:$0xff]   ;;  %v2213_v56 = vld [vmem:[%s2506_s20 + $0x80] sm:$0xff]   ;;  %vm783_vm1 = vcmask 556032  }
  0x2a   : > { %2238 = vmatpush1.bf16.msra.mxu0 %v2237_v45  ;;  %2250 = vmatpush1.bf16.msra.mxu1 %v2237_v45  ;;  %v2212_v45 = vld [vmem:[%s2506_s20 + $0x78] sm:$0xff]   ;;  %v2156_v57 = vunpack.c.l.bf16 %v2204_v55  ;;  %v2192_v58 = vunpack.c.l.bf16 %v2213_v56 }
  0x2b   : > { %v2188_v47 = vunpack.c.l.bf16 %v2212_v45  ;;  %v2189_v51 = vunpack.c.h.bf16 %v2212_v45 }
  0x2d   : > { %2087 = vmatmul.mubr.msk.f32.vlgmr.msra.gmra.mrb[0].mxu0 %vm393_vm0, %v2128_v48  ;;  %2105 = vmatmul.mubr.msk.f32.vlgmr.msra.gmra.mrb[0].mxu1 %vm393_vm0, %v2164_v49  ;;  %v1311_v48 = vld [vmem:[%s2512_s25 + $0xb8] sm:$0xff]  ;;  %v1314_v49 = vld [vmem:[%s2512_s25 + $0xd0] sm:$0xff] }
  0x2e   : > { %572 = vmatprep.mubr.f32.mxu0 %v2382_v10  ;;  %680 = vmatprep.mubr.f32.mxu1 %v2382_v10 }
  0x2f   : > { %1701 = vperm.xlu1 %2262, %v1291_v61   ;;  %1716 = vperm.xlu0 %2263, %v1294_v62   ;;  %v2157_v61 = vunpack.c.h.bf16 %v2204_v55  ;;  %v2193_v62 = vunpack.c.h.bf16 %v2213_v56 }
  0x31   : > { %2088 = vmatmul.mubr.msk.f32.gmra.mrb[2].mxu0 %vm393_vm0, %v2129_v53  ;;  %2106 = vmatmul.mubr.msk.f32.gmra.mrb[2].mxu1 %vm393_vm0, %v2165_v54  ;;  %v1313_v53 = vld [vmem:[%s2512_s25 + $0xc8] sm:$0xff]  ;;  %v1316_v54 = vld [vmem:[%s2512_s25 + $0xe0] sm:$0xff] }
  0x32   : > { %578 = vmatprep.mubr.f32.mxu0 %v2382_v10  ;;  %686 = vmatprep.mubr.f32.mxu1 %v2382_v10 }
  0x33   : > { %1711 = vperm.xlu1 %2262, %v1293_v1   ;;  %1726 = vperm.xlu0 %2263, %v1296_v2   ;;  %v2214_v1 = vld [vmem:[%s2506_s20 + $0x88] sm:$0xff]  }
  0x34   : > { %v2196_v3 = vunpack.c.l.bf16 %v2214_v1 }
  0x35   : > { %2089 = vmatmul.mubr.msk.f32.gmra.mrb[4].mxu0 %vm393_vm0, %v2132_v59  ;;  %2107 = vmatmul.mubr.msk.f32.gmra.mrb[4].mxu1 %vm393_vm0, %v2168_v60  ;;  %v1315_v59 = vld [vmem:[%s2512_s25 + $0xd8] sm:$0xff]  ;;  %v1318_v60 = vld [vmem:[%s2512_s25 + $0xf0] sm:$0xff] }
  0x36   : > { %584 = vmatprep.mubr.f32.mxu0 %v2382_v10  ;;  %692 = vmatprep.mubr.f32.mxu1 %v2382_v10 }
  0x37   : > { %1721 = vperm.xlu1 %2262, %v1295_v7   ;;  %1736 = vperm.xlu0 %2263, %v1298_v8  }
  0x39   : > { %2090 = vmatmul.mubr.msk.f32.gmra.mrb[6].mxu0 %vm393_vm0, %v2133_v63  ;;  %2108 = vmatmul.mubr.msk.f32.gmra.mrb[6].mxu1 %vm393_vm0, %v2169_v0  ;;  %v1317_v63 = vld [vmem:[%s2512_s25 + $0xe8] sm:$0xff]  ;;  %v2205_v0 = vld [vmem:[%s2506_s20 + $0x40] sm:$0xff]  }
  0x3a   : > { %590 = vmatprep.mubr.f32.mxu0 %v2382_v10  ;;  %698 = vmatprep.mubr.f32.mxu1 %v2382_v10  ;;  %v2160_v2 = vunpack.c.l.bf16 %v2205_v0 }
  0x3b   : > { %1731 = vperm.xlu1 %2262, %v1297_v12   ;;  %1746 = vperm.xlu0 %2263, %v1300_v13  }
  0x3d   : > { %2091 = vmatmul.mubr.msk.f32.gmra.mrb[8].mxu0 %vm393_vm0, %v2136_v5  ;;  %2109 = vmatmul.mubr.msk.f32.gmra.mrb[8].mxu1 %vm393_vm0, %v2172_v6  ;;  %v2161_v5 = vunpack.c.h.bf16 %v2205_v0  ;;  %v2197_v6 = vunpack.c.h.bf16 %v2214_v1 }
  0x3e   : > { %596 = vmatprep.mubr.f32.mxu0 %v2382_v10  ;;  %704 = vmatprep.mubr.f32.mxu1 %v2382_v10 }
  0x3f   : > { %1741 = vperm.xlu1 %2262, %v1299_v18   ;;  %1756 = vperm.xlu0 %2263, %v1302_v19  }
  0x41   : > { %2092 = vmatmul.mubr.msk.f32.gmra.mrb[10].mxu0 %vm393_vm0, %v2137_v9  ;;  %2110 = vmatmul.mubr.msk.f32.gmra.mrb[10].mxu1 %vm393_vm0, %v2173_v11 }
  0x42   : > { %602 = vmatprep.mubr.f32.mxu0 %v2382_v10  ;;  %710 = vmatprep.mubr.f32.mxu1 %v2382_v10 }
  0x43   : > { %1751 = vperm.xlu1 %2262, %v1301_v22   ;;  %1766 = vperm.xlu0 %2263, %v1304_v23  }
  0x45   : > { %2093 = vmatmul.mubr.msk.f32.gmra.mrb[12].mxu0 %vm393_vm0, %v2140_v16  ;;  %2111 = vmatmul.mubr.msk.f32.gmra.mrb[12].mxu1 %vm393_vm0, %v2176_v17 }
  0x46   : > { %608 = vmatprep.mubr.f32.mxu0 %v2382_v10  ;;  %716 = vmatprep.mubr.f32.mxu1 %v2382_v10 }
  0x47   : > { %1761 = vperm.xlu1 %2262, %v1303_v28   ;;  %1776 = vperm.xlu0 %2263, %v1306_v29  }
  0x49   : > { %2094 = vmatmul.mubr.msk.f32.gmra.mrb[14].mxu0 %vm393_vm0, %v2141_v20  ;;  %2112 = vmatmul.mubr.msk.f32.gmra.mrb[14].mxu1 %vm393_vm0, %v2177_v21 }
  0x4a   : > { %614 = vmatprep.mubr.f32.mxu0 %v2382_v10  ;;  %722 = vmatprep.mubr.f32.mxu1 %v2382_v10 }
  0x4b   : > { %1771 = vperm.xlu1 %2262, %v1305_v32   ;;  %1786 = vperm.xlu0 %2263, %v1308_v33  }
  0x4d   : > { %2095 = vmatmul.mubr.msk.f32.gmra.mrb[16].mxu0 %vm393_vm0, %v2144_v26  ;;  %2113 = vmatmul.mubr.msk.f32.gmra.mrb[16].mxu1 %vm393_vm0, %v2180_v27 }
  0x4e   : > { %620 = vmatprep.mubr.f32.mxu0 %v2382_v10  ;;  %728 = vmatprep.mubr.f32.mxu1 %v2382_v10 }
  0x4f   : > { %1781 = vperm.xlu1 %2262, %v1307_v38   ;;  %1796 = vperm.xlu0 %2263, %v1310_v39  }
  0x51   : > { %2096 = vmatmul.mubr.msk.f32.gmra.mrb[18].mxu0 %vm393_vm0, %v2145_v30  ;;  %2114 = vmatmul.mubr.msk.f32.gmra.mrb[18].mxu1 %vm393_vm0, %v2181_v31 }
  0x52   : > { %626 = vmatprep.mubr.f32.mxu0 %v2382_v10  ;;  %734 = vmatprep.mubr.f32.mxu1 %v2382_v10 }
  0x53   : > { %1791 = vperm.xlu1 %2262, %v1309_v42   ;;  %1806 = vperm.xlu0 %2263, %v1312_v43  }
  0x55   : > { %2097 = vmatmul.mubr.msk.f32.gmra.mrb[20].mxu0 %vm393_vm0, %v2148_v36  ;;  %2115 = vmatmul.mubr.msk.f32.gmra.mrb[20].mxu1 %vm393_vm0, %v2184_v37 }
  0x56   : > { %632 = vmatprep.mubr.f32.mxu0 %v2382_v10  ;;  %740 = vmatprep.mubr.f32.mxu1 %v2382_v10 }
  0x57   : > { %1801 = vperm.xlu1 %2262, %v1311_v48   ;;  %1816 = vperm.xlu0 %2263, %v1314_v49  }
  0x59   : > { %2098 = vmatmul.mubr.msk.f32.gmra.mrb[22].mxu0 %vm393_vm0, %v2149_v40  ;;  %2116 = vmatmul.mubr.msk.f32.gmra.mrb[22].mxu1 %vm393_vm0, %v2185_v41 }
  0x5a   : > { %638 = vmatprep.mubr.f32.mxu0 %v2382_v10  ;;  %746 = vmatprep.mubr.f32.mxu1 %v2382_v10 }
  0x5b   : > { %1811 = vperm.xlu1 %2262, %v1313_v53   ;;  %1826 = vperm.xlu0 %2263, %v1316_v54  }
  0x5d   : > { %2099 = vmatmul.mubr.msk.f32.gmra.mrb[24].mxu0 %vm393_vm0, %v2152_v46  ;;  %2117 = vmatmul.mubr.msk.f32.gmra.mrb[24].mxu1 %vm393_vm0, %v2188_v47 }
  0x5e   : > { %644 = vmatprep.mubr.f32.mxu0 %v2382_v10  ;;  %752 = vmatprep.mubr.f32.mxu1 %v2382_v10 }
  0x5f   : > { %1821 = vperm.xlu1 %2262, %v1315_v59   ;;  %1836 = vperm.xlu0 %2263, %v1318_v60  }
  0x61   : > { %2100 = vmatmul.mubr.msk.f32.gmra.mrb[26].mxu0 %vm393_vm0, %v2153_v50  ;;  %2118 = vmatmul.mubr.msk.f32.gmra.mrb[26].mxu1 %vm393_vm0, %v2189_v51 }
  0x62   : > { %650 = vmatprep.mubr.f32.mxu0 %v2382_v10  ;;  %758 = vmatprep.mubr.f32.mxu1 %v2382_v10 }
  0x63   : > { %1831 = vperm.xlu1 %2262, %v1317_v63  }
  0x65   : > { %2101 = vmatmul.mubr.msk.f32.gmra.mrb[28].mxu0 %vm393_vm0, %v2156_v57  ;;  %2119 = vmatmul.mubr.msk.f32.gmra.mrb[28].mxu1 %vm393_vm0, %v2192_v58 }
  0x66   : > { %656 = vmatprep.mubr.f32.mxu0 %v2382_v10  ;;  %764 = vmatprep.mubr.f32.mxu1 %v2382_v10 }
  0x67   : > { %1841 = vperm.xlu1 %2262, %v1319_v4  }
  0x69   : > { %2102 = vmatmul.mubr.msk.f32.gmra.mrb[30].mxu0 %vm393_vm0, %v2157_v61  ;;  %2120 = vmatmul.mubr.msk.f32.gmra.mrb[30].mxu1 %vm393_vm0, %v2193_v62 }
  0x6a   : > { %662 = vmatprep.mubr.f32.mxu0 %v2382_v10  ;;  %770 = vmatprep.mubr.f32.mxu1 %v2382_v10 }
  0x6d   : > { %2103 = vmatmul.mubr.msk.f32.gmra.mrb[32].mxu0 %vm393_vm0, %v2160_v2  ;;  %2121 = vmatmul.mubr.msk.f32.gmra.mrb[32].mxu1 %vm393_vm0, %v2196_v3 }
  0x6e   : > { %668 = vmatprep.mubr.f32.mxu0 %v2382_v10  ;;  %776 = vmatprep.mubr.f32.mxu1 %v2382_v10 }
  0x71   : > { %2104 = vmatmul.mubr.msk.f32.gmra.mrb[34].mxu0 %vm393_vm0, %v2161_v5  ;;  %2122 = vmatmul.mubr.msk.f32.gmra.mrb[34].mxu1 %vm393_vm0, %v2197_v6 }
 0x100   : > { %v2636_v7 = vpop.f32.mrb[0].mxu0  ;;  %v2638_v8 = vpop.f32.mrb[0].mxu1 }
 0x101   : > { %v2640_v9 = vpop.f32.mrb[1].mxu0  ;;  %v2642_v11 = vpop.f32.mrb[1].mxu1 }
 0x102   : > { %v784_v12 = vsel %vm783_vm1, %v2640_v9, 0.0  ;;  %v856_v13 = vsel %vm783_vm1, %v2642_v11, 0.0 }
 0x103   : > { %v785_v10 = vadd.f32 %v784_v12, %v2636_v7  ;;  %v857_v14 = vadd.f32 %v856_v13, %v2638_v8 }
 0x104   : > { %v2650_v15 = vpop.f32.mrb[2].mxu0  ;;  %v2652_v16 = vpop.f32.mrb[2].mxu1 }
 0x105   : > { %v2654_v17 = vpop.f32.mrb[3].mxu1  ;;  %786 = vadd.xlane.f32.xlu0 %v785_v10  ;;  %v2656_v18 = vpop.f32.mrb[3].mxu0 }
 0x106   : > { %v860_v19 = vsel %vm783_vm1, %v2654_v17, 0.0  ;;  %v788_v20 = vsel %vm783_vm1, %v2656_v18, 0.0 }
 0x107   : > { %v861_v21 = vadd.f32 %v860_v19, %v2652_v16  ;;  %v789_v22 = vadd.f32 %v788_v20, %v2650_v15 }
 0x108   : > { %v2664_v23 = vpop.f32.mrb[4].mxu0  ;;  %v2666_v24 = vpop.f32.mrb[4].mxu1 }
 0x109   : > { %862 = vadd.xlane.f32.xlu1 %v861_v21  ;;  %858 = vadd.xlane.f32.xlu0 %v857_v14  ;;  %v2668_v25 = vpop.f32.mrb[5].mxu0  ;;  %v2670_v26 = vpop.f32.mrb[5].mxu1 }
 0x10a   : > { %v792_v27 = vsel %vm783_vm1, %v2668_v25, 0.0  ;;  %v864_v28 = vsel %vm783_vm1, %v2670_v26, 0.0 }
 0x10b   : > { %v793_v29 = vadd.f32 %v792_v27, %v2664_v23  ;;  %v865_v30 = vadd.f32 %v864_v28, %v2666_v24 }
 0x10c   : > { %v2678_v31 = vpop.f32.mrb[6].mxu0  ;;  %v2680_v32 = vpop.f32.mrb[6].mxu1 }
 0x10d   : > { %790 = vadd.xlane.f32.xlu0 %v789_v22  ;;  %794 = vadd.xlane.f32.xlu1 %v793_v29  ;;  %v2682_v33 = vpop.f32.mrb[7].mxu0  ;;  %v2684_v34 = vpop.f32.mrb[7].mxu1 }
 0x10e   : > { %v796_v35 = vsel %vm783_vm1, %v2682_v33, 0.0  ;;  %v868_v36 = vsel %vm783_vm1, %v2684_v34, 0.0 }
 0x10f   : > { %v797_v37 = vadd.f32 %v796_v35, %v2678_v31  ;;  %v869_v38 = vadd.f32 %v868_v36, %v2680_v32 }
 0x110   : > { %v2692_v39 = vpop.f32.mrb[8].mxu0  ;;  %v2694_v40 = vpop.f32.mrb[8].mxu1 }
 0x111   : > { %866 = vadd.xlane.f32.xlu0 %v865_v30  ;;  %798 = vadd.xlane.f32.xlu1 %v797_v37  ;;  %v2696_v41 = vpop.f32.mrb[9].mxu0  ;;  %v2698_v42 = vpop.f32.mrb[9].mxu1 }
 0x112   : > { %v800_v43 = vsel %vm783_vm1, %v2696_v41, 0.0  ;;  %v872_v44 = vsel %vm783_vm1, %v2698_v42, 0.0 }
 0x113   : > { %v801_v45 = vadd.f32 %v800_v43, %v2692_v39  ;;  %v873_v46 = vadd.f32 %v872_v44, %v2694_v40 }
 0x114   : > { %v2706_v47 = vpop.f32.mrb[10].mxu0  ;;  %v2708_v48 = vpop.f32.mrb[10].mxu1 }
 0x115   : > { %870 = vadd.xlane.f32.xlu1 %v869_v38  ;;  %802 = vadd.xlane.f32.xlu0 %v801_v45  ;;  %v2710_v49 = vpop.f32.mrb[11].mxu0  ;;  %v2712_v50 = vpop.f32.mrb[11].mxu1 }
 0x116   : > { %v804_v51 = vsel %vm783_vm1, %v2710_v49, 0.0  ;;  %v876_v53 = vsel %vm783_vm1, %v2712_v50, 0.0 }
 0x117   : > { %v805_v54 = vadd.f32 %v804_v51, %v2706_v47  ;;  %v877_v55 = vadd.f32 %v876_v53, %v2708_v48 }
 0x118   : > { %v2720_v56 = vpop.f32.mrb[12].mxu0  ;;  %v2722_v57 = vpop.f32.mrb[12].mxu1 }
 0x119   : > { %874 = vadd.xlane.f32.xlu0 %v873_v46  ;;  %806 = vadd.xlane.f32.xlu1 %v805_v54  ;;  %v2724_v58 = vpop.f32.mrb[13].mxu0  ;;  %v2726_v59 = vpop.f32.mrb[13].mxu1 }
 0x11a   : > { %v808_v60 = vsel %vm783_vm1, %v2724_v58, 0.0  ;;  %v880_v61 = vsel %vm783_vm1, %v2726_v59, 0.0 }
 0x11b   : > { %v809_v62 = vadd.f32 %v808_v60, %v2720_v56  ;;  %v881_v63 = vadd.f32 %v880_v61, %v2722_v57 }
 0x11c   : > { %v2734_v0 = vpop.f32.mrb[14].mxu0  ;;  %v2736_v1 = vpop.f32.mrb[14].mxu1 }
 0x11d   : > { %878 = vadd.xlane.f32.xlu1 %v877_v55  ;;  %810 = vadd.xlane.f32.xlu0 %v809_v62  ;;  %v2738_v2 = vpop.f32.mrb[15].mxu0  ;;  %v2740_v3 = vpop.f32.mrb[15].mxu1 }
 0x11e   : > { %v812_v4 = vsel %vm783_vm1, %v2738_v2, 0.0  ;;  %v884_v5 = vsel %vm783_vm1, %v2740_v3, 0.0  ;;  %v2788_v55 = vpop.permute.xlu1 %1686 }
 0x11f   : > { %v813_v6 = vadd.f32 %v812_v4, %v2734_v0  ;;  %v885_v12 = vadd.f32 %v884_v5, %v2736_v1  ;;  %3744 = vst [vmem:[#allocation2_spill] sm:$0xff] %v2788_v55  ;;  %v2834_v55 = vpop.permute.xlu0 %1691 }
 0x120   : > { %v2748_v13 = vpop.f32.mrb[16].mxu0  ;;  %v2750_v10 = vpop.f32.mrb[16].mxu1  ;;  %3753 = vst [vmem:[#allocation11_spill] sm:$0xff] %v2834_v55 }
 0x121   : > { %882 = vadd.xlane.f32.xlu0 %v881_v63  ;;  %814 = vadd.xlane.f32.xlu1 %v813_v6  ;;  %v2752_v14 = vpop.f32.mrb[17].mxu0  ;;  %v2754_v19 = vpop.f32.mrb[17].mxu1 }
 0x122   : > { %v816_v20 = vsel %vm783_vm1, %v2752_v14, 0.0  ;;  %v888_v21 = vsel %vm783_vm1, %v2754_v19, 0.0 }
 0x123   : > { %v817_v22 = vadd.f32 %v816_v20, %v2748_v13  ;;  %v889_v27 = vadd.f32 %v888_v21, %v2750_v10 }
 0x124   : > { %v2762_v28 = vpop.f32.mrb[18].mxu0  ;;  %v2764_v29 = vpop.f32.mrb[18].mxu1 }
 0x125   : > { %886 = vadd.xlane.f32.xlu1 %v885_v12  ;;  %818 = vadd.xlane.f32.xlu0 %v817_v22  ;;  %v2766_v30 = vpop.f32.mrb[19].mxu0  ;;  %v2768_v35 = vpop.f32.mrb[19].mxu1 }
 0x126   : > { %v820_v36 = vsel %vm783_vm1, %v2766_v30, 0.0  ;;  %v892_v37 = vsel %vm783_vm1, %v2768_v35, 0.0 }
 0x127   : > { %v821_v38 = vadd.f32 %v820_v36, %v2762_v28  ;;  %v893_v43 = vadd.f32 %v892_v37, %v2764_v29 }
 0x128   : > { %v2776_v44 = vpop.f32.mrb[20].mxu0  ;;  %v2778_v45 = vpop.f32.mrb[20].mxu1 }
 0x129   : > { %890 = vadd.xlane.f32.xlu0 %v889_v27  ;;  %822 = vadd.xlane.f32.xlu1 %v821_v38  ;;  %v2780_v46 = vpop.f32.mrb[21].mxu0  ;;  %v2782_v51 = vpop.f32.mrb[21].mxu1 }
 0x12a   : > { %v824_v53 = vsel %vm783_vm1, %v2780_v46, 0.0  ;;  %v896_v54 = vsel %vm783_vm1, %v2782_v51, 0.0 }
 0x12b   : > { %v825_v60 = vadd.f32 %v824_v53, %v2776_v44  ;;  %v897_v61 = vadd.f32 %v896_v54, %v2778_v45  ;;  %v2818_v53 = vpop.permute.xlu1 %1696 }
 0x12c   : > { %v2792_v62 = vpop.f32.mrb[22].mxu0  ;;  %v2794_v63 = vpop.f32.mrb[22].mxu1  ;;  %3748 = vst [vmem:[#allocation6_spill] sm:$0xff] %v2818_v53 }
 0x12d   : > { %3745 = vst [vmem:[#allocation3_spill] sm:$0xff] %v2794_v63  ;;  %894 = vadd.xlane.f32.xlu1 %v893_v43  ;;  %826 = vadd.xlane.f32.xlu0 %v825_v60  ;;  %v2796_v4 = vpop.f32.mrb[23].mxu0  ;;  %v2798_v5 = vpop.f32.mrb[23].mxu1 }
 0x12e   : > { %v828_v6 = vsel %vm783_vm1, %v2796_v4, 0.0  ;;  %v900_v12 = vsel %vm783_vm1, %v2798_v5, 0.0 }
 0x12f   : > { %v829_v20 = vadd.f32 %v828_v6, %v2792_v62  ;;  %v901_v21 = vadd.f32 %v900_v12, %v2794_v63 }
 0x130   : > { %v2806_v22 = vpop.f32.mrb[24].mxu0  ;;  %v2808_v27 = vpop.f32.mrb[24].mxu1 }
 0x131   : > { %3746 = vst [vmem:[#allocation4_spill] sm:$0xff] %v2808_v27  ;;  %898 = vadd.xlane.f32.xlu0 %v897_v61  ;;  %830 = vadd.xlane.f32.xlu1 %v829_v20  ;;  %v2810_v36 = vpop.f32.mrb[25].mxu0  ;;  %v2812_v37 = vpop.f32.mrb[25].mxu1 }
 0x132   : > { %3747 = vst [vmem:[#allocation5_spill] sm:$0xff] %v2812_v37  ;;  %v832_v38 = vsel %vm783_vm1, %v2810_v36, 0.0  ;;  %v904_v43 = vsel %vm783_vm1, %v2812_v37, 0.0 }
 0x133   : > { %v833_v54 = vadd.f32 %v832_v38, %v2806_v22  ;;  %v905_v60 = vadd.f32 %v904_v43, %v2808_v27 }
 0x134   : > { %v2822_v6 = vpop.f32.mrb[26].mxu0  ;;  %v2824_v61 = vpop.f32.mrb[26].mxu1 }
 0x135   : > { %3749 = vst [vmem:[#allocation7_spill] sm:$0xff] %v2822_v6  ;;  %3750 = vst [vmem:[#allocation8_spill] sm:$0xff] %v2824_v61  ;;  %902 = vadd.xlane.f32.xlu1 %v901_v21  ;;  %834 = vadd.xlane.f32.xlu0 %v833_v54  ;;  %v2826_v12 = vpop.f32.mrb[27].mxu0  ;;  %v2828_v20 = vpop.f32.mrb[27].mxu1 }
 0x136   : > { %3751 = vst [vmem:[#allocation9_spill] sm:$0xff] %v2826_v12  ;;  %3752 = vst [vmem:[#allocation10_spill] sm:$0xff] %v2828_v20  ;;  %v836_v52 = vsel %vm783_vm1, %v2826_v12, 0.0  ;;  %v908_v53 = vsel %vm783_vm1, %v2828_v20, 0.0  ;;  %v2850_v20 = vpop.permute.xlu1 %1701 }
 0x137   : > { %v837_v38 = vadd.f32 %v836_v52, %v2822_v6  ;;  %v909_v43 = vadd.f32 %v908_v53, %v2824_v61  ;;  %3758 = vst [vmem:[#allocation16_spill] sm:$0xff] %v2850_v20 }
 0x138   : > { %v2838_v37 = vpop.f32.mrb[28].mxu0  ;;  %v2840_v21 = vpop.f32.mrb[28].mxu1 }
 0x139   : > { %3754 = vst [vmem:[#allocation12_spill] sm:$0xff] %v2838_v37  ;;  %3755 = vst [vmem:[#allocation13_spill] sm:$0xff] %v2840_v21  ;;  %906 = vadd.xlane.f32.xlu0 %v905_v60  ;;  %838 = vadd.xlane.f32.xlu1 %v837_v38  ;;  %v2842_v54 = vpop.f32.mrb[29].mxu0  ;;  %v2844_v27 = vpop.f32.mrb[29].mxu1 }
 0x13a   : > { %3756 = vst [vmem:[#allocation14_spill] sm:$0xff] %v2842_v54  ;;  %3757 = vst [vmem:[#allocation15_spill] sm:$0xff] %v2844_v27  ;;  %v840_v12 = vsel %vm783_vm1, %v2842_v54, 0.0  ;;  %v912_v55 = vsel %vm783_vm1, %v2844_v27, 0.0  ;;  %v2866_v27 = vpop.permute.xlu0 %1706 }
 0x13b   : > { %v841_v52 = vadd.f32 %v840_v12, %v2838_v37  ;;  %v913_v53 = vadd.f32 %v912_v55, %v2840_v21  ;;  %3763 = vst [vmem:[#allocation21_spill] sm:$0xff] %v2866_v27 }
 0x13c   : > { %v2854_v61 = vpop.f32.mrb[30].mxu0  ;;  %v2856_v60 = vpop.f32.mrb[30].mxu1 }
 0x13d   : > { %3759 = vst [vmem:[#allocation17_spill] sm:$0xff] %v2854_v61  ;;  %3760 = vst [vmem:[#allocation18_spill] sm:$0xff] %v2856_v60  ;;  %910 = vadd.xlane.f32.xlu1 %v909_v43  ;;  %842 = vadd.xlane.f32.xlu0 %v841_v52  ;;  %v2858_v38 = vpop.f32.mrb[31].mxu0  ;;  %v2860_v6 = vpop.f32.mrb[31].mxu1 }
 0x13e   : > { %3761 = vst [vmem:[#allocation19_spill] sm:$0xff] %v2858_v38  ;;  %3762 = vst [vmem:[#allocation20_spill] sm:$0xff] %v2860_v6  ;;  %v844_v54 = vsel %vm783_vm1, %v2858_v38, 0.0  ;;  %v916_v20 = vsel %vm783_vm1, %v2860_v6, 0.0  ;;  %v2882_v6 = vpop.permute.xlu1 %1711 }
 0x13f   : > { %v845_v55 = vadd.f32 %v844_v54, %v2854_v61  ;;  %v917_v12 = vadd.f32 %v916_v20, %v2856_v60  ;;  %3768 = vst [vmem:[#allocation26_spill] sm:$0xff] %v2882_v6 }
 0x140   : > { %v2870_v21 = vpop.f32.mrb[32].mxu0  ;;  %v2872_v43 = vpop.f32.mrb[32].mxu1 }
 0x141   : > { %3764 = vst [vmem:[#allocation22_spill] sm:$0xff] %v2870_v21  ;;  %3765 = vst [vmem:[#allocation23_spill] sm:$0xff] %v2872_v43  ;;  %914 = vadd.xlane.f32.xlu0 %v913_v53  ;;  %846 = vadd.xlane.f32.xlu1 %v845_v55  ;;  %v2874_v52 = vpop.f32.mrb[33].mxu0  ;;  %v2876_v37 = vpop.f32.mrb[33].mxu1 }
 0x142   : > { %3766 = vst [vmem:[#allocation24_spill] sm:$0xff] %v2874_v52  ;;  %3767 = vst [vmem:[#allocation25_spill] sm:$0xff] %v2876_v37  ;;  %v848_v38 = vsel %vm783_vm1, %v2874_v52, 0.0  ;;  %v920_v27 = vsel %vm783_vm1, %v2876_v37, 0.0  ;;  %v2894_v52 = vpop.permute.xlu0 %1716 }
 0x143   : > { %v849_v20 = vadd.f32 %v848_v38, %v2870_v21  ;;  %v921_v54 = vadd.f32 %v920_v27, %v2872_v43  ;;  %3772 = vst [vmem:[#allocation30_spill] sm:$0xff] %v2894_v52  ;;  %v1321_v52 = vld [vmem:[%s2512_s25 + $0x108] sm:$0xff] }
 0x144   : > { %v2886_v60 = vpop.f32.mrb[34].mxu0  ;;  %v2888_v53 = vpop.f32.mrb[34].mxu1 }
 0x145   : > { %3769 = vst [vmem:[#allocation27_spill] sm:$0xff] %v2886_v60  ;;  %918 = vadd.xlane.f32.xlu1 %v917_v12  ;;  %850 = vadd.xlane.f32.xlu0 %v849_v20  ;;  %v2890_v55 = vpop.f32.mrb[35].mxu0  ;;  %v2892_v61 = vpop.f32.mrb[35].mxu1 }
 0x146   : > { %3770 = vst [vmem:[#allocation28_spill] sm:$0xff] %v2890_v55  ;;  %3771 = vst [vmem:[#allocation29_spill] sm:$0xff] %v2892_v61  ;;  %v852_v6 = vsel %vm783_vm1, %v2890_v55, 0.0  ;;  %v924_v27 = vsel %vm783_vm1, %v2892_v61, 0.0  ;;  %v2902_v12 = vpop.permute.xlu1 %1721  ;;  %v2904_v20 = vpop.permute.xlu0 %1726 }
 0x147   : > { %v853_v38 = vadd.f32 %v852_v6, %v2886_v60  ;;  %v925_v37 = vadd.f32 %v924_v27, %v2888_v53  ;;  %3773 = vst [vmem:[#allocation31_spill] sm:$0xff] %v2902_v12  ;;  %3774 = vst [vmem:[#allocation32_spill] sm:$0xff] %v2904_v20  ;;  %v1320_v6 = vld [vmem:[%s2512_s25 + $0x100] sm:$0xff] }
 0x149   : > { %922 = vadd.xlane.f32.xlu0 %v921_v54 }
 0x14a   : > { %v2906_v43 = vpop.permute.xlu1 %1731  ;;  %v2908_v21 = vpop.permute.xlu0 %1736 }
 0x14b   : > { %3775 = vst [vmem:[#allocation33_spill] sm:$0xff] %v2906_v43  ;;  %3776 = vst [vmem:[#allocation34_spill] sm:$0xff] %v2908_v21 }
 0x14e   : > { %v2911_v63 = vpop.permute.xlu1 %1741  ;;  %v2913_v55 = vpop.permute.xlu0 %1746 }
 0x14f   : > { %3777 = vst [vmem:[#allocation35_spill] sm:$0xff] %v2911_v63  ;;  %3778 = vst [vmem:[#allocation36_spill] sm:$0xff] %v2913_v55 }
 0x152   : > { %v2915_v61 = vpop.permute.xlu1 %1751  ;;  %v2918_v60 = vpop.permute.xlu0 %1756 }
 0x153   : > { %3779 = vst [vmem:[#allocation37_spill] sm:$0xff] %v2915_v61  ;;  %3780 = vst [vmem:[#allocation38_spill] sm:$0xff] %v2918_v60 }
 0x156   : > { %1851 = vperm.xlu1 %2262, %v1321_v52   ;;  %v2920_v54 = vpop.permute.xlu1 %1761  ;;  %v2922_v27 = vpop.permute.xlu0 %1766 }
 0x157   : > { %3781 = vst [vmem:[#allocation39_spill] sm:$0xff] %v2920_v54  ;;  %3782 = vst [vmem:[#allocation40_spill] sm:$0xff] %v2922_v27 }
 0x15a   : > { %v2924_v20 = vpop.permute.xlu1 %1771  ;;  %v2926_v12 = vpop.permute.xlu0 %1776 }
 0x15b   : > { %3783 = vst [vmem:[#allocation41_spill] sm:$0xff] %v2924_v20  ;;  %3784 = vst [vmem:[#allocation42_spill] sm:$0xff] %v2926_v12 }
 0x15e   : > { %v2928_v21 = vpop.permute.xlu1 %1781  ;;  %v2930_v63 = vpop.permute.xlu0 %1786 }
 0x15f   : > { %1846 = vperm.xlu0 %2263, %v1320_v6   ;;  %3785 = vst [vmem:[#allocation43_spill] sm:$0xff] %v2928_v21  ;;  %3786 = vst [vmem:[#allocation44_spill] sm:$0xff] %v2930_v63 }
 0x162   : > { %v2932_v52 = vpop.permute.xlu1 %1791  ;;  %v2934_v55 = vpop.permute.xlu0 %1796 }
 0x163   : > { %3787 = vst [vmem:[#allocation45_spill] sm:$0xff] %v2932_v52  ;;  %3788 = vst [vmem:[#allocation46_spill] sm:$0xff] %v2934_v55 }
 0x166   : > { %v2936_v61 = vpop.permute.xlu1 %1801  ;;  %v2938_v6 = vpop.permute.xlu0 %1806 }
 0x167   : > { %3789 = vst [vmem:[#allocation47_spill] sm:$0xff] %v2936_v61  ;;  %3790 = vst [vmem:[#allocation48_spill] sm:$0xff] %v2938_v6 }
 0x16a   : > { %v2940_v60 = vpop.permute.xlu1 %1811  ;;  %v2942_v27 = vpop.permute.xlu0 %1816 }
 0x16b   : > { %3791 = vst [vmem:[#allocation49_spill] sm:$0xff] %v2940_v60  ;;  %3792 = vst [vmem:[#allocation50_spill] sm:$0xff] %v2942_v27 }
 0x16e   : > { %v2944_v20 = vpop.permute.xlu1 %1821  ;;  %v2946_v54 = vpop.permute.xlu0 %1826 }
 0x16f   : > { %3793 = vst [vmem:[#allocation51_spill] sm:$0xff] %v2944_v20  ;;  %3794 = vst [vmem:[#allocation52_spill] sm:$0xff] %v2946_v54 }
 0x172   : > { %v2948_v43 = vpop.permute.xlu1 %1831  ;;  %v2950_v63 = vpop.permute.xlu0 %1836 }
 0x173   : > { %3795 = vst [vmem:[#allocation53_spill] sm:$0xff] %v2948_v43  ;;  %3796 = vst [vmem:[#allocation54_spill] sm:$0xff] %v2950_v63 }
 0x176   : > { %v2952_v52 = vpop.permute.xlu1 %1841 }
 0x177   : > { %3797 = vst [vmem:[#allocation55_spill] sm:$0xff] %v2952_v52 }
 0x17a   : > { %854 = vadd.xlane.f32.xlu1 %v853_v38 }
 0x17e   : > { %926 = vadd.xlane.f32.xlu1 %v925_v37 }
 0x192   : > { %v787_v55 = vpop.xlane.xlu0 %786 }
 0x193   : > { %v928_v61 = vmul.f32 0.0051020407, %v787_v55 }
 0x195   : > { %v2955_v38 = vsub.f32 %v2636_v7, %v928_v61  ;;  %v2958_v37 = vsub.f32 %v2640_v9, %v928_v61 }
 0x196   : > { %v863_v6 = vpop.xlane.xlu1 %862  ;;  %v859_v27 = vpop.xlane.xlu0 %858 }
 0x197   : > { %3798 = vst [vmem:[#allocation56_spill] sm:$0xff] %v2958_v37  ;;  %v947_v60 = vmul.f32 0.0051020407, %v863_v6  ;;  %v946_v20 = vmul.f32 0.0051020407, %v859_v27  ;;  %v1036_v54 = vmul.f32 %v2955_v38, %v2955_v38  ;;  %v1037_v63 = vmul.f32 %v2958_v37, %v2958_v37 }
 0x199   : > { %v2965_v52 = vsub.f32 %v2638_v8, %v946_v20  ;;  %v2968_v55 = vsub.f32 %v2642_v11, %v946_v20  ;;  %v2971_v7 = vsub.f32 %v2654_v17, %v947_v60  ;;  %v1108_v6 = vsel %vm783_vm1, %v1037_v63, 0.0 }
 0x19a   : > { %v791_v9 = vpop.xlane.xlu0 %790  ;;  %v795_v61 = vpop.xlane.xlu1 %794  ;;  %v1109_v21 = vadd.f32 %v1108_v6, %v1036_v54  ;;  %v2991_v20 = vsub.f32 %v2652_v16, %v947_v60 }
 0x19b   : > { %3799 = vst [vmem:[#allocation57_spill] sm:$0xff] %v2971_v7  ;;  %v929_v27 = vmul.f32 0.0051020407, %v791_v9  ;;  %v930_v43 = vmul.f32 0.0051020407, %v795_v61  ;;  %v1072_v12 = vmul.f32 %v2965_v52, %v2965_v52  ;;  %v1073_v8 = vmul.f32 %v2968_v55, %v2968_v55 }
 0x19c   : > { %1110 = vadd.xlane.f32.xlu0 %v1109_v21 }
 0x19d   : > { %v2979_v37 = vsub.f32 %v2650_v15, %v929_v27  ;;  %v2982_v11 = vsub.f32 %v2656_v18, %v929_v27  ;;  %v2985_v17 = vsub.f32 %v2664_v23, %v930_v43  ;;  %v2988_v63 = vsub.f32 %v2668_v25, %v930_v43 }
 0x19e   : > { %v867_v54 = vpop.xlane.xlu0 %866  ;;  %v799_v9 = vpop.xlane.xlu1 %798  ;;  %v1180_v61 = vsel %vm783_vm1, %v1073_v8, 0.0  ;;  %v1075_v15 = vmul.f32 %v2971_v7, %v2971_v7 }
 0x19f   : > { %3800 = vst [vmem:[#allocation58_spill] sm:$0xff] %v2982_v11  ;;  %3801 = vst [vmem:[#allocation59_spill] sm:$0xff] %v2985_v17  ;;  %v948_v6 = vmul.f32 0.0051020407, %v867_v54  ;;  %v931_v18 = vmul.f32 0.0051020407, %v799_v9  ;;  %v1181_v27 = vadd.f32 %v1180_v61, %v1072_v12  ;;  %v1040_v23 = vmul.f32 %v2985_v17, %v2985_v17 }
 0x1a0   : > { %3802 = vst [vmem:[#allocation60_spill] sm:$0xff] %v2988_v63  ;;  %v1041_v25 = vmul.f32 %v2988_v63, %v2988_v63  ;;  %v1038_v16 = vmul.f32 %v2979_v37, %v2979_v37  ;;  %v1039_v21 = vmul.f32 %v2982_v11, %v2982_v11  ;;  %v1074_v63 = vmul.f32 %v2991_v20, %v2991_v20 }
 0x1a1   : > { %v3005_v60 = vsub.f32 %v2666_v24, %v948_v6  ;;  %v3008_v43 = vsub.f32 %v2670_v26, %v948_v6  ;;  %v3011_v12 = vsub.f32 %v2682_v33, %v931_v18  ;;  %1182 = vadd.xlane.f32.xlu0 %v1181_v27  ;;  %v1184_v17 = vsel %vm783_vm1, %v1075_v15, 0.0 }
 0x1a2   : > { %v871_v8 = vpop.xlane.xlu1 %870  ;;  %v803_v54 = vpop.xlane.xlu0 %802  ;;  %v1116_v9 = vsel %vm783_vm1, %v1041_v25, 0.0  ;;  %v1112_v61 = vsel %vm783_vm1, %v1039_v21, 0.0  ;;  %v3019_v6 = vsub.f32 %v2678_v31, %v931_v18 }
 0x1a3   : > { %3803 = vst [vmem:[#allocation61_spill] sm:$0xff] %v3011_v12  ;;  %v949_v24 = vmul.f32 0.0051020407, %v871_v8  ;;  %v932_v7 = vmul.f32 0.0051020407, %v803_v54  ;;  %v1117_v11 = vadd.f32 %v1116_v9, %v1040_v23  ;;  %v1113_v26 = vadd.f32 %v1112_v61, %v1038_v16 }
 0x1a4   : > { %v1076_v33 = vmul.f32 %v3005_v60, %v3005_v60  ;;  %v1077_v27 = vmul.f32 %v3008_v43, %v3008_v43  ;;  %v1043_v25 = vmul.f32 %v3011_v12, %v3011_v12  ;;  %v1185_v8 = vadd.f32 %v1184_v17, %v1074_v63 }
 0x1a5   : > { %v3028_v21 = vsub.f32 %v2684_v34, %v949_v24  ;;  %v3031_v15 = vsub.f32 %v2692_v39, %v932_v7  ;;  %v3034_v23 = vsub.f32 %v2696_v41, %v932_v7  ;;  %1118 = vadd.xlane.f32.xlu0 %v1117_v11  ;;  %1114 = vadd.xlane.f32.xlu1 %v1113_v26 }
 0x1a6   : > { %v875_v31 = vpop.xlane.xlu0 %874  ;;  %v807_v18 = vpop.xlane.xlu1 %806  ;;  %v1188_v16 = vsel %vm783_vm1, %v1077_v27, 0.0  ;;  %v3040_v12 = vsub.f32 %v2680_v32, %v949_v24  ;;  %v1042_v41 = vmul.f32 %v3019_v6, %v3019_v6  ;;  %v1120_v7 = vsel %vm783_vm1, %v1043_v25, 0.0 }
 0x1a7   : > { %v950_v54 = vmul.f32 0.0051020407, %v875_v31  ;;  %v933_v9 = vmul.f32 0.0051020407, %v807_v18  ;;  %v1189_v61 = vadd.f32 %v1188_v16, %v1076_v33  ;;  %v1044_v34 = vmul.f32 %v3031_v15, %v3031_v15 }
 0x1a8   : > { %v1045_v39 = vmul.f32 %v3034_v23, %v3034_v23  ;;  %v1079_v32 = vmul.f32 %v3028_v21, %v3028_v21  ;;  %v1078_v16 = vmul.f32 %v3040_v12, %v3040_v12 }
 0x1a9   : > { %v3048_v11 = vsub.f32 %v2694_v40, %v950_v54  ;;  %v3051_v17 = vsub.f32 %v2698_v42, %v950_v54  ;;  %v3054_v63 = vsub.f32 %v2710_v49, %v933_v9  ;;  %1190 = vadd.xlane.f32.xlu0 %v1189_v61  ;;  %v3059_v24 = vsub.f32 %v2706_v47, %v933_v9 }
 0x1aa   : > { %1186 = vadd.xlane.f32.xlu1 %v1185_v8  ;;  %v879_v26 = vpop.xlane.xlu1 %878  ;;  %v811_v33 = vpop.xlane.xlu0 %810  ;;  %v1124_v27 = vsel %vm783_vm1, %v1045_v39, 0.0  ;;  %v1121_v49 = vadd.f32 %v1120_v7, %v1042_v41  ;;  %v1192_v61 = vsel %vm783_vm1, %v1079_v32, 0.0 }
 0x1ab   : > { %v951_v40 = vmul.f32 0.0051020407, %v879_v26  ;;  %v934_v25 = vmul.f32 0.0051020407, %v811_v33  ;;  %v1125_v31 = vadd.f32 %v1124_v27, %v1044_v34  ;;  %v1080_v42 = vmul.f32 %v3048_v11, %v3048_v11 }
 0x1ac   : > { %v1081_v18 = vmul.f32 %v3051_v17, %v3051_v17  ;;  %v1047_v47 = vmul.f32 %v3054_v63, %v3054_v63  ;;  %v1046_v7 = vmul.f32 %v3059_v24, %v3059_v24  ;;  %v1193_v32 = vadd.f32 %v1192_v61, %v1078_v16 }
 0x1ad   : > { %v3071_v8 = vsub.f32 %v2712_v50, %v951_v40  ;;  %v3074_v54 = vsub.f32 %v2720_v56, %v934_v25  ;;  %v3077_v9 = vsub.f32 %v2724_v58, %v934_v25  ;;  %1126 = vadd.xlane.f32.xlu0 %v1125_v31  ;;  %v3087_v27 = vsub.f32 %v2708_v48, %v951_v40 }
 0x1ae   : > { %1122 = vadd.xlane.f32.xlu1 %v1121_v49  ;;  %v883_v34 = vpop.xlane.xlu0 %882  ;;  %v815_v39 = vpop.xlane.xlu1 %814  ;;  %v1196_v41 = vsel %vm783_vm1, %v1081_v18, 0.0  ;;  %v1128_v50 = vsel %vm783_vm1, %v1047_v47, 0.0 }
 0x1af   : > { %v952_v26 = vmul.f32 0.0051020407, %v883_v34  ;;  %v935_v33 = vmul.f32 0.0051020407, %v815_v39  ;;  %v1197_v56 = vadd.f32 %v1196_v41, %v1080_v42  ;;  %v1048_v58 = vmul.f32 %v3074_v54, %v3074_v54 }
 0x1b0   : > { %v1049_v25 = vmul.f32 %v3077_v9, %v3077_v9  ;;  %v1083_v31 = vmul.f32 %v3071_v8, %v3071_v8  ;;  %v1129_v47 = vadd.f32 %v1128_v50, %v1046_v7 }
 0x1b1   : > { %v3094_v49 = vsub.f32 %v2722_v57, %v952_v26  ;;  %v3097_v18 = vsub.f32 %v2726_v59, %v952_v26  ;;  %v3100_v42 = vsub.f32 %v2738_v2, %v935_v33  ;;  %1198 = vadd.xlane.f32.xlu0 %v1197_v56  ;;  %v3106_v41 = vsub.f32 %v2734_v0, %v935_v33 }
 0x1b2   : > { %1194 = vadd.xlane.f32.xlu1 %v1193_v32  ;;  %v887_v48 = vpop.xlane.xlu1 %886  ;;  %v819_v40 = vpop.xlane.xlu0 %818  ;;  %v1132_v16 = vsel %vm783_vm1, %v1049_v25, 0.0  ;;  %v1082_v2 = vmul.f32 %v3087_v27, %v3087_v27  ;;  %v1200_v26 = vsel %vm783_vm1, %v1083_v31, 0.0 }
 0x1b3   : > { %v953_v61 = vmul.f32 0.0051020407, %v887_v48  ;;  %v936_v34 = vmul.f32 0.0051020407, %v819_v40  ;;  %v1133_v39 = vadd.f32 %v1132_v16, %v1048_v58  ;;  %v1084_v57 = vmul.f32 %v3094_v49, %v3094_v49 }
 0x1b4   : > { %v1085_v59 = vmul.f32 %v3097_v18, %v3097_v18  ;;  %v1051_v0 = vmul.f32 %v3100_v42, %v3100_v42  ;;  %v1050_v16 = vmul.f32 %v3106_v41, %v3106_v41 }
 0x1b5   : > { %v3114_v56 = vsub.f32 %v2740_v3, %v953_v61  ;;  %v3117_v7 = vsub.f32 %v2748_v13, %v936_v34  ;;  %v3120_v50 = vsub.f32 %v2752_v14, %v936_v34  ;;  %1134 = vadd.xlane.f32.xlu0 %v1133_v39  ;;  %v3125_v33 = vsub.f32 %v2736_v1, %v953_v61 }
 0x1b6   : > { %1130 = vadd.xlane.f32.xlu1 %v1129_v47  ;;  %v891_v58 = vpop.xlane.xlu0 %890  ;;  %v823_v32 = vpop.xlane.xlu1 %822  ;;  %v1204_v25 = vsel %vm783_vm1, %v1085_v59, 0.0  ;;  %v1201_v14 = vadd.f32 %v1200_v26, %v1082_v2  ;;  %v1136_v39 = vsel %vm783_vm1, %v1051_v0, 0.0 }
 0x1b7   : > { %v954_v3 = vmul.f32 0.0051020407, %v891_v58  ;;  %v937_v31 = vmul.f32 0.0051020407, %v823_v32  ;;  %v1205_v48 = vadd.f32 %v1204_v25, %v1084_v57  ;;  %v1052_v13 = vmul.f32 %v3117_v7, %v3117_v7 }
 0x1b8   : > { %v1053_v40 = vmul.f32 %v3120_v50, %v3120_v50  ;;  %v1087_v1 = vmul.f32 %v3114_v56, %v3114_v56  ;;  %v1086_v26 = vmul.f32 %v3125_v33, %v3125_v33  ;;  %v1137_v0 = vadd.f32 %v1136_v39, %v1050_v16 }
 0x1b9   : > { %v3137_v47 = vsub.f32 %v2750_v10, %v954_v3  ;;  %v3140_v61 = vsub.f32 %v2754_v19, %v954_v3  ;;  %v3143_v34 = vsub.f32 %v2766_v30, %v937_v31  ;;  %1206 = vadd.xlane.f32.xlu0 %v1205_v48  ;;  %v3153_v25 = vsub.f32 %v2762_v28, %v937_v31 }
 0x1ba   : > { %1202 = vadd.xlane.f32.xlu1 %v1201_v14  ;;  %v895_v57 = vpop.xlane.xlu1 %894  ;;  %v827_v59 = vpop.xlane.xlu0 %826  ;;  %v1140_v2 = vsel %vm783_vm1, %v1053_v40, 0.0  ;;  %v1208_v10 = vsel %vm783_vm1, %v1087_v1, 0.0 }
 0x1bb   : > { %v955_v58 = vmul.f32 0.0051020407, %v895_v57  ;;  %v938_v32 = vmul.f32 0.0051020407, %v827_v59  ;;  %v1141_v19 = vadd.f32 %v1140_v2, %v1052_v13  ;;  %v1088_v30 = vmul.f32 %v3137_v47, %v3137_v47 }
 0x1bc   : > { %v1089_v3 = vmul.f32 %v3140_v61, %v3140_v61  ;;  %v1055_v48 = vmul.f32 %v3143_v34, %v3143_v34  ;;  %v1209_v1 = vadd.f32 %v1208_v10, %v1086_v26  ;;  %v2384_v2 = vmov 0  }
 0x1bd   : > { %v3160_v14 = vsub.f32 %v2768_v35, %v955_v58  ;;  %v3163_v40 = vsub.f32 %v2776_v44, %v938_v32  ;;  %v3166_v13 = vsub.f32 %v2780_v46, %v938_v32  ;;  %1142 = vadd.xlane.f32.xlu0 %v1141_v19  ;;  %2265 = vset.pattern.permute.xlu1 %v2384_v2 }
 0x1be   : > { %1138 = vadd.xlane.f32.xlu1 %v1137_v0  ;;  %v899_v28 = vpop.xlane.xlu0 %898  ;;  %v831_v31 = vpop.xlane.xlu1 %830  ;;  %v1212_v16 = vsel %vm783_vm1, %v1089_v3, 0.0  ;;  %2264 = vset.pattern.permute.xlu0 %v2384_v2  ;;  %v3172_v44 = vsub.f32 %v2764_v29, %v955_v58  ;;  %v1054_v32 = vmul.f32 %v3153_v25, %v3153_v25  ;;  %v1144_v26 = vsel %vm783_vm1, %v1055_v48, 0.0  ;;  %v3810_v2 = vld [vmem:[#allocation3_spill] sm:$0xff] }
 0x1bf   : > { %3804 = vst [vmem:[#allocation62_spill] sm:$0xff] %v3163_v40  ;;  %3805 = vst [vmem:[#allocation63_spill] sm:$0xff] %v3166_v13  ;;  %v956_v39 = vmul.f32 0.0051020407, %v899_v28  ;;  %v939_v57 = vmul.f32 0.0051020407, %v831_v31  ;;  %v1213_v59 = vadd.f32 %v1212_v16, %v1088_v30  ;;  %v1056_v35 = vmul.f32 %v3163_v40, %v3163_v40 }
 0x1c0   : > { %v1057_v46 = vmul.f32 %v3166_v13, %v3166_v13  ;;  %v1091_v29 = vmul.f32 %v3160_v14, %v3160_v14 }
 0x1c1   : > { %v3180_v10 = vsub.f32 %v2778_v45, %v956_v39  ;;  %v3183_v19 = vsub.f32 %v2782_v51, %v956_v39  ;;  %v3186_v30 = vsub.f32 %v2796_v4, %v939_v57  ;;  %1214 = vadd.xlane.f32.xlu0 %v1213_v59  ;;  %v3191_v58 = vsub.f32 %v2792_v62, %v939_v57 }
 0x1c2   : > { %1210 = vadd.xlane.f32.xlu1 %v1209_v1  ;;  %v903_v0 = vpop.xlane.xlu1 %902  ;;  %v835_v3 = vpop.xlane.xlu0 %834  ;;  %v1148_v48 = vsel %vm783_vm1, %v1057_v46, 0.0  ;;  %v1145_v4 = vadd.f32 %v1144_v26, %v1054_v32  ;;  %v1090_v39 = vmul.f32 %v3172_v44, %v3172_v44 }
 0x1c3   : > { %3806 = vst [vmem:[#allocation64_spill] sm:$0xff] %v3180_v10  ;;  %3807 = vst [vmem:[#allocation65_spill] sm:$0xff] %v3183_v19  ;;  %v957_v45 = vmul.f32 0.0051020407, %v903_v0  ;;  %v940_v28 = vmul.f32 0.0051020407, %v835_v3  ;;  %v1149_v31 = vadd.f32 %v1148_v48, %v1056_v35  ;;  %v1092_v51 = vmul.f32 %v3180_v10, %v3180_v10 }
 0x1c4   : > { %v1093_v16 = vmul.f32 %v3183_v19, %v3183_v19  ;;  %v1059_v62 = vmul.f32 %v3186_v30, %v3186_v30  ;;  %v1216_v35 = vsel %vm783_vm1, %v1091_v29, 0.0  ;;  %v3817_v10 = vld [vmem:[#allocation7_spill] sm:$0xff] }
 0x1c5   : > { %v3203_v1 = vsub.f32 %v2798_v5, %v957_v45  ;;  %v3206_v57 = vsub.f32 %v2806_v22, %v940_v28  ;;  %v3209_v59 = vsub.f32 %v2810_v36, %v940_v28  ;;  %1150 = vadd.xlane.f32.xlu0 %v1149_v31  ;;  %v3213_v46 = vsub.f32 %v3810_v2, %v957_v45  ;;  %v3813_v2 = vld [vmem:[#allocation5_spill] sm:$0xff] }
 0x1c6   : > { %1146 = vadd.xlane.f32.xlu1 %v1145_v4  ;;  %v907_v32 = vpop.xlane.xlu0 %906  ;;  %v839_v26 = vpop.xlane.xlu1 %838  ;;  %v1220_v0 = vsel %vm783_vm1, %v1093_v16, 0.0  ;;  %v1058_v5 = vmul.f32 %v3191_v58, %v3191_v58  ;;  %v1152_v22 = vsel %vm783_vm1, %v1059_v62, 0.0  ;;  %v1217_v29 = vadd.f32 %v1216_v35, %v1090_v39  ;;  %v3811_v4 = vld [vmem:[#allocation4_spill] sm:$0xff]  ;;  %v3815_v62 = vld [vmem:[#allocation9_spill] sm:$0xff] }
 0x1c7   : > { %3808 = vst [vmem:[#allocation66_spill] sm:$0xff] %v3206_v57  ;;  %3809 = vst [vmem:[#allocation67_spill] sm:$0xff] %v3209_v59  ;;  %v958_v3 = vmul.f32 0.0051020407, %v907_v32  ;;  %v941_v48 = vmul.f32 0.0051020407, %v839_v26  ;;  %v1221_v36 = vadd.f32 %v1220_v0, %v1092_v51  ;;  %v1060_v28 = vmul.f32 %v3206_v57, %v3206_v57 }
 0x1c8   : > { %v1061_v45 = vmul.f32 %v3209_v59, %v3209_v59  ;;  %v1095_v31 = vmul.f32 %v3203_v1, %v3203_v1  ;;  %v1153_v35 = vadd.f32 %v1152_v22, %v1058_v5  ;;  %v3821_v5 = vld [vmem:[#allocation12_spill] sm:$0xff] }
 0x1c9   : > { %v3226_v16 = vsub.f32 %v3811_v4, %v958_v3  ;;  %v3229_v19 = vsub.f32 %v3813_v2, %v958_v3  ;;  %1222 = vadd.xlane.f32.xlu0 %v1221_v36  ;;  %v3232_v32 = vsub.f32 %v3815_v62, %v941_v48  ;;  %v1094_v4 = vmul.f32 %v3213_v46, %v3213_v46  ;;  %v3819_v2 = vld [vmem:[#allocation10_spill] sm:$0xff] }
 0x1ca   : > { %1218 = vadd.xlane.f32.xlu1 %v1217_v29  ;;  %v911_v51 = vpop.xlane.xlu1 %910  ;;  %v843_v26 = vpop.xlane.xlu0 %842  ;;  %v1156_v39 = vsel %vm783_vm1, %v1061_v45, 0.0  ;;  %v3238_v13 = vsub.f32 %v3817_v10, %v941_v48  ;;  %v1224_v29 = vsel %vm783_vm1, %v1095_v31, 0.0 }
 0x1cb   : > { %3812 = vst [vmem:[#allocation3_spill] sm:$0xff] %v3226_v16  ;;  %3814 = vst [vmem:[#allocation4_spill] sm:$0xff] %v3229_v19  ;;  %v959_v0 = vmul.f32 0.0051020407, %v911_v51  ;;  %v942_v59 = vmul.f32 0.0051020407, %v843_v26  ;;  %v1157_v57 = vadd.f32 %v1156_v39, %v1060_v28  ;;  %v1096_v3 = vmul.f32 %v3226_v16, %v3226_v16 }
 0x1cc   : > { %3816 = vst [vmem:[#allocation5_spill] sm:$0xff] %v3232_v32  ;;  %3818 = vst [vmem:[#allocation9_spill] sm:$0xff] %v3238_v13  ;;  %v1097_v36 = vmul.f32 %v3229_v19, %v3229_v19  ;;  %v3823_v28 = vld [vmem:[#allocation14_spill] sm:$0xff]  ;;  %v1063_v26 = vmul.f32 %v3232_v32, %v3232_v32  ;;  %v1225_v19 = vadd.f32 %v1224_v29, %v1094_v4  ;;  %v3826_v16 = vld [vmem:[#allocation13_spill] sm:$0xff] }
 0x1cd   : > { %v3246_v45 = vsub.f32 %v3819_v2, %v959_v0  ;;  %v3249_v22 = vsub.f32 %v3821_v5, %v942_v59  ;;  %v3252_v62 = vsub.f32 %v3823_v28, %v942_v59  ;;  %1158 = vadd.xlane.f32.xlu0 %v1157_v57  ;;  %v1062_v57 = vmul.f32 %v3238_v13, %v3238_v13  ;;  %v3828_v4 = vld [vmem:[#allocation15_spill] sm:$0xff]  ;;  %v3833_v13 = vld [vmem:[#allocation20_spill] sm:$0xff] }
 0x1ce   : > { %1154 = vadd.xlane.f32.xlu1 %v1153_v35  ;;  %v915_v10 = vpop.xlane.xlu0 %914  ;;  %v847_v48 = vpop.xlane.xlu1 %846  ;;  %v1228_v51 = vsel %vm783_vm1, %v1097_v36, 0.0  ;;  %v3825_v35 = vld [vmem:[#allocation8_spill] sm:$0xff]  ;;  %v3830_v29 = vld [vmem:[#allocation19_spill] sm:$0xff] }
 0x1cf   : > { %3820 = vst [vmem:[#allocation7_spill] sm:$0xff] %v3246_v45  ;;  %3822 = vst [vmem:[#allocation10_spill] sm:$0xff] %v3249_v22  ;;  %v960_v39 = vmul.f32 0.0051020407, %v915_v10  ;;  %v943_v31 = vmul.f32 0.0051020407, %v847_v48  ;;  %v1229_v2 = vadd.f32 %v1228_v51, %v1096_v3  ;;  %v1064_v5 = vmul.f32 %v3249_v22, %v3249_v22 }
 0x1d0   : > { %3824 = vst [vmem:[#allocation12_spill] sm:$0xff] %v3252_v62  ;;  %v1065_v59 = vmul.f32 %v3252_v62, %v3252_v62  ;;  %v3264_v28 = vsub.f32 %v3825_v35, %v959_v0  ;;  %v1099_v36 = vmul.f32 %v3246_v45, %v3246_v45  ;;  %v1160_v0 = vsel %vm783_vm1, %v1063_v26, 0.0  ;;  %v3832_v45 = vld [vmem:[#allocation17_spill] sm:$0xff] }
 0x1d1   : > { %v3269_v10 = vsub.f32 %v3826_v16, %v960_v39  ;;  %v3272_v3 = vsub.f32 %v3828_v4, %v960_v39  ;;  %v3275_v48 = vsub.f32 %v3830_v29, %v943_v31  ;;  %1230 = vadd.xlane.f32.xlu0 %v1229_v2  ;;  %v3284_v39 = vsub.f32 %v3832_v45, %v943_v31  ;;  %v3837_v31 = vld [vmem:[#allocation24_spill] sm:$0xff] }
 0x1d2   : > { %1226 = vadd.xlane.f32.xlu1 %v1225_v19  ;;  %v919_v51 = vpop.xlane.xlu1 %918  ;;  %v851_v62 = vpop.xlane.xlu0 %850  ;;  %v1164_v22 = vsel %vm783_vm1, %v1065_v59, 0.0  ;;  %v1098_v19 = vmul.f32 %v3264_v28, %v3264_v28  ;;  %v1161_v2 = vadd.f32 %v1160_v0, %v1062_v57  ;;  %v1232_v26 = vsel %vm783_vm1, %v1099_v36, 0.0  ;;  %v3839_v0 = vld [vmem:[#allocation18_spill] sm:$0xff] }
 0x1d3   : > { %3827 = vst [vmem:[#allocation14_spill] sm:$0xff] %v3269_v10  ;;  %3829 = vst [vmem:[#allocation8_spill] sm:$0xff] %v3272_v3  ;;  %v1100_v35 = vmul.f32 %v3269_v10, %v3269_v10  ;;  %v1101_v16 = vmul.f32 %v3272_v3, %v3272_v3  ;;  %v961_v4 = vmul.f32 0.0051020407, %v919_v51  ;;  %v944_v29 = vmul.f32 0.0051020407, %v851_v62 }
 0x1d4   : > { %3831 = vst [vmem:[#allocation13_spill] sm:$0xff] %v3275_v48  ;;  %v1165_v32 = vadd.f32 %v1164_v22, %v1064_v5  ;;  %v1067_v10 = vmul.f32 %v3275_v48, %v3275_v48  ;;  %v3835_v3 = vld [vmem:[#allocation22_spill] sm:$0xff]  ;;  %v1066_v36 = vmul.f32 %v3284_v39, %v3284_v39 }
 0x1d5   : > { %v1236_v59 = vsel %vm783_vm1, %v1101_v16, 0.0  ;;  %v3293_v40 = vsub.f32 %v3833_v13, %v961_v4  ;;  %v3296_v45 = vsub.f32 %v3835_v3, %v944_v29  ;;  %v3299_v62 = vsub.f32 %v3837_v31, %v944_v29  ;;  %v3841_v16 = vld [vmem:[#allocation23_spill] sm:$0xff] }
 0x1d6   : > { %1166 = vadd.xlane.f32.xlu0 %v1165_v32  ;;  %v923_v22 = vpop.xlane.xlu0 %922  ;;  %1162 = vadd.xlane.f32.xlu1 %v1161_v2  ;;  %v1237_v57 = vadd.f32 %v1236_v59, %v1100_v35  ;;  %v3308_v3 = vsub.f32 %v3839_v0, %v961_v4  ;;  %v3843_v32 = vld [vmem:[#allocation25_spill] sm:$0xff]  ;;  %v1233_v2 = vadd.f32 %v1232_v26, %v1098_v19 }
 0x1d7   : > { %3834 = vst [vmem:[#allocation15_spill] sm:$0xff] %v3293_v40  ;;  %3836 = vst [vmem:[#allocation19_spill] sm:$0xff] %v3296_v45  ;;  %v962_v5 = vmul.f32 0.0051020407, %v923_v22  ;;  %v1068_v51 = vmul.f32 %v3296_v45, %v3296_v45  ;;  %v1069_v13 = vmul.f32 %v3299_v62, %v3299_v62  ;;  %v1103_v35 = vmul.f32 %v3293_v40, %v3293_v40 }
 0x1d8   : > { %3838 = vst [vmem:[#allocation17_spill] sm:$0xff] %v3299_v62  ;;  %3840 = vst [vmem:[#allocation20_spill] sm:$0xff] %v3308_v3  ;;  %v1168_v22 = vsel %vm783_vm1, %v1067_v10, 0.0 }
 0x1d9   : > { %v3311_v29 = vsub.f32 %v3841_v16, %v962_v5  ;;  %v3314_v31 = vsub.f32 %v3843_v32, %v962_v5  ;;  %v1172_v59 = vsel %vm783_vm1, %v1069_v13, 0.0  ;;  %v1102_v5 = vmul.f32 %v3308_v3, %v3308_v3  ;;  %v3328_v16 = vpop.permute.xlu1 %1851 }
 0x1da   : > { %1238 = vadd.xlane.f32.xlu0 %v1237_v57  ;;  %1234 = vadd.xlane.f32.xlu1 %v1233_v2  ;;  %v1173_v0 = vadd.f32 %v1172_v59, %v1068_v51  ;;  %v1169_v19 = vadd.f32 %v1168_v22, %v1066_v36  ;;  %v1240_v13 = vsel %vm783_vm1, %v1103_v35, 0.0  ;;  %3845 = vst [vmem:[#allocation18_spill] sm:$0xff] %v3328_v16  ;;  %v3846_v2 = vld [vmem:[#allocation27_spill] sm:$0xff]  ;;  %v3848_v59 = vld [vmem:[#allocation28_spill] sm:$0xff] }
 0x1db   : > { %3842 = vst [vmem:[#allocation22_spill] sm:$0xff] %v3311_v29  ;;  %3844 = vst [vmem:[#allocation24_spill] sm:$0xff] %v3314_v31  ;;  %v1104_v62 = vmul.f32 %v3311_v29, %v3311_v29  ;;  %v1105_v4 = vmul.f32 %v3314_v31, %v3314_v31  ;;  %v1241_v10 = vadd.f32 %v1240_v13, %v1102_v5 }
 0x1dd   : > { %v1244_v26 = vsel %vm783_vm1, %v1105_v4, 0.0 }
 0x1de   : > { %1174 = vadd.xlane.f32.xlu0 %v1173_v0  ;;  %v1245_v57 = vadd.f32 %v1244_v26, %v1104_v62  ;;  %1170 = vadd.xlane.f32.xlu1 %v1169_v19  ;;  %v3851_v0 = vld [vmem:[#allocation29_spill] sm:$0xff] }
 0x1e2   : > { %1246 = vadd.xlane.f32.xlu0 %v1245_v57  ;;  %1242 = vadd.xlane.f32.xlu1 %v1241_v10 }
 0x207   : > { %v855_v32 = vpop.xlane.xlu1 %854 }
 0x208   : > { %v945_v31 = vmul.f32 0.0051020407, %v855_v32  ;;  %v3352_v32 = vpop.permute.xlu0 %1846 }
 0x209   : > { %3853 = vst [vmem:[#allocation29_spill] sm:$0xff] %v3352_v32 }
 0x20a   : > { %v3331_v51 = vsub.f32 %v3846_v2, %v945_v31  ;;  %v3334_v29 = vsub.f32 %v3848_v59, %v945_v31 }
 0x20b   : > { %v927_v36 = vpop.xlane.xlu1 %926 }
 0x20c   : > { %3847 = vst [vmem:[#allocation23_spill] sm:$0xff] %v3331_v51  ;;  %3849 = vst [vmem:[#allocation25_spill] sm:$0xff] %v3334_v29  ;;  %v1070_v62 = vmul.f32 %v3331_v51, %v3331_v51  ;;  %v1071_v35 = vmul.f32 %v3334_v29, %v3334_v29  ;;  %v963_v22 = vmul.f32 0.0051020407, %v927_v36 }
 0x20e   : > { %v3341_v4 = vsub.f32 %v2888_v53, %v963_v22  ;;  %v3344_v5 = vsub.f32 %v3851_v0, %v963_v22  ;;  %v1176_v19 = vsel %vm783_vm1, %v1071_v35, 0.0 }
 0x20f   : > { %v1177_v26 = vadd.f32 %v1176_v19, %v1070_v62 }
 0x210   : > { %3850 = vst [vmem:[#allocation27_spill] sm:$0xff] %v3341_v4  ;;  %3852 = vst [vmem:[#allocation28_spill] sm:$0xff] %v3344_v5  ;;  %v1106_v31 = vmul.f32 %v3341_v4, %v3341_v4  ;;  %v1107_v57 = vmul.f32 %v3344_v5, %v3344_v5 }
 0x211   : > { %1178 = vadd.xlane.f32.xlu1 %v1177_v26 }
 0x212   : > { %v1248_v13 = vsel %vm783_vm1, %v1107_v57, 0.0 }
 0x213   : > { %v1249_v10 = vadd.f32 %v1248_v13, %v1106_v31 }
 0x215   : > { %1250 = vadd.xlane.f32.xlu1 %v1249_v10 }
 0x229   : > { %v1111_v53 = vpop.xlane.xlu0 %1110 }
 0x22a   : > { %v1252_v2 = vmul.f32 0.0051020407, %v1111_v53 }
 0x22c   : > { %v1324_v59 = vadd.f32 1e-05, %v1252_v2 }
 0x22e   : > { %v1183_v36 = vpop.xlane.xlu0 %1182  ;;  %2268 = vrsqrt.f32 %v1324_v59 }
 0x22f   : > { %v1270_v35 = vmul.f32 0.0051020407, %v1183_v36  ;;  %v2340_v36 = vld [vmem:[%s2512_s25] sm:$0xff] }
 0x231   : > { %v1342_v62 = vadd.f32 1e-05, %v1270_v35 }
 0x232   : > { %v1119_v22 = vpop.xlane.xlu0 %1118  ;;  %v1115_v19 = vpop.xlane.xlu1 %1114 }
 0x233   : > { %2270 = vrsqrt.f32 %v1342_v62  ;;  %v1254_v0 = vmul.f32 0.0051020407, %v1119_v22  ;;  %v1253_v5 = vmul.f32 0.0051020407, %v1115_v19 }
 0x235   : > { %v1326_v26 = vadd.f32 1e-05, %v1254_v0  ;;  %v1325_v4 = vadd.f32 1e-05, %v1253_v5 }
 0x236   : > { %v1191_v57 = vpop.xlane.xlu0 %1190 }
 0x237   : > { %v1272_v31 = vmul.f32 0.0051020407, %v1191_v57  ;;  %v1187_v13 = vpop.xlane.xlu1 %1186  ;;  %2272 = vrsqrt.f32 %v1325_v4  ;;  %v2341_v4 = vld [vmem:[%s2512_s25 + $0x90] sm:$0xff] }
 0x238   : > { %v1271_v10 = vmul.f32 0.0051020407, %v1187_v13  ;;  %v2269_v29 = vpop.eup %2268  ;;  %2274 = vrsqrt.f32 %v1326_v26 }
 0x239   : > { %v1344_v53 = vadd.f32 1e-05, %v1272_v31  ;;  %v1396_v35 = vmul.f32 %v2340_v36, %v2269_v29 }
 0x23a   : > { %v1343_v2 = vadd.f32 1e-05, %v1271_v10  ;;  %v1127_v59 = vpop.xlane.xlu0 %1126 }
 0x23b   : > { %v1123_v62 = vpop.xlane.xlu1 %1122  ;;  %1434 = vperm.xlu0 %2264, %v1396_v35   ;;  %v1256_v5 = vmul.f32 0.0051020407, %v1127_v59  ;;  %v2342_v35 = vld [vmem:[%s2512_s25 + $0x8] sm:$0xff] }
 0x23c   : > { %2276 = vrsqrt.f32 %v1343_v2  ;;  %v1255_v22 = vmul.f32 0.0051020407, %v1123_v62 }
 0x23d   : > { %v2271_v19 = vpop.eup %2270  ;;  %2278 = vrsqrt.f32 %v1344_v53  ;;  %v1328_v31 = vadd.f32 1e-05, %v1256_v5  ;;  %v2343_v5 = vld [vmem:[%s2512_s25 + $0x10] sm:$0xff] }
 0x23e   : > { %v1327_v0 = vadd.f32 1e-05, %v1255_v22  ;;  %v1199_v57 = vpop.xlane.xlu0 %1198  ;;  %v1414_v13 = vmul.f32 %v2341_v4, %v2271_v19 }
 0x23f   : > { %v1195_v51 = vpop.xlane.xlu1 %1194  ;;  %v1274_v29 = vmul.f32 0.0051020407, %v1199_v57 }
 0x240   : > { %v1273_v45 = vmul.f32 0.0051020407, %v1195_v51  ;;  %1524 = vperm.xlu1 %2265, %v1414_v13   ;;  %2280 = vrsqrt.f32 %v1327_v0  ;;  %v2344_v13 = vld [vmem:[%s2512_s25 + $0x98] sm:$0xff] }
 0x241   : > { %v2273_v26 = vpop.eup %2272  ;;  %v1346_v22 = vadd.f32 1e-05, %v1274_v29 }
 0x242   : > { %v1345_v10 = vadd.f32 1e-05, %v1273_v45  ;;  %v1135_v2 = vpop.xlane.xlu0 %1134  ;;  %v1397_v53 = vmul.f32 %v2342_v35, %v2273_v26  ;;  %v2275_v62 = vpop.eup %2274 }
 0x243   : > { %v1131_v36 = vpop.xlane.xlu1 %1130  ;;  %v1398_v0 = vmul.f32 %v2343_v5, %v2275_v62  ;;  %v1258_v26 = vmul.f32 0.0051020407, %v1135_v2 }
 0x244   : > { %2282 = vrsqrt.f32 %v1345_v10  ;;  %1439 = vperm.xlu1 %2265, %v1397_v53   ;;  %v1257_v19 = vmul.f32 0.0051020407, %v1131_v36  ;;  %v2345_v36 = vld [vmem:[%s2512_s25 + $0xa0] sm:$0xff] }
 0x245   : > { %2284 = vrsqrt.f32 %v1328_v31  ;;  %v1330_v5 = vadd.f32 1e-05, %v1258_v26 }
 0x246   : > { %v2277_v59 = vpop.eup %2276  ;;  %v1207_v51 = vpop.xlane.xlu0 %1206  ;;  %2286 = vrsqrt.f32 %v1346_v22  ;;  %v1329_v10 = vadd.f32 1e-05, %v1257_v19  ;;  %v2346_v22 = vld [vmem:[%s2512_s25 + $0x18] sm:$0xff] }
 0x247   : > { %v1203_v4 = vpop.xlane.xlu1 %1202  ;;  %v1415_v57 = vmul.f32 %v2344_v13, %v2277_v59  ;;  %v2279_v45 = vpop.eup %2278  ;;  %v1276_v59 = vmul.f32 0.0051020407, %v1207_v51  ;;  %v2347_v13 = vld [vmem:[%s2512_s25 + $0xa8] sm:$0xff]  ;;  %v2348_v51 = vld [vmem:[%s2512_s25 + $0x20] sm:$0xff] }
 0x248   : > { %v1275_v32 = vmul.f32 0.0051020407, %v1203_v4  ;;  %1444 = vperm.xlu1 %2265, %v1398_v0   ;;  %v1416_v53 = vmul.f32 %v2345_v36, %v2279_v45 }
 0x249   : > { %1529 = vperm.xlu0 %2264, %v1415_v57   ;;  %v1348_v45 = vadd.f32 1e-05, %v1276_v59 }
 0x24a   : > { %v1347_v35 = vadd.f32 1e-05, %v1275_v32  ;;  %v1143_v31 = vpop.xlane.xlu0 %1142  ;;  %v2281_v16 = vpop.eup %2280 }
 0x24b   : > { %v1139_v29 = vpop.xlane.xlu1 %1138  ;;  %v1399_v2 = vmul.f32 %v2346_v22, %v2281_v16 }
 0x24c   : > { %2288 = vrsqrt.f32 %v1347_v35  ;;  %1534 = vperm.xlu1 %2265, %v1416_v53   ;;  %v1259_v36 = vmul.f32 0.0051020407, %v1139_v29  ;;  %v2349_v29 = vld [vmem:[%s2512_s25 + $0xb0] sm:$0xff] }
 0x24d   : > { %2290 = vrsqrt.f32 %v1329_v10 }
 0x24e   : > { %v2283_v62 = vpop.eup %2282  ;;  %v1215_v4 = vpop.xlane.xlu0 %1214  ;;  %2292 = vrsqrt.f32 %v1330_v5 }
 0x24f   : > { %v1211_v0 = vpop.xlane.xlu1 %1210  ;;  %v1417_v19 = vmul.f32 %v2347_v13, %v2283_v62  ;;  %v2285_v32 = vpop.eup %2284  ;;  %v1260_v62 = vmul.f32 0.0051020407, %v1143_v31  ;;  %v2350_v13 = vld [vmem:[%s2512_s25 + $0xb8] sm:$0xff] }
 0x250   : > { %v1277_v57 = vmul.f32 0.0051020407, %v1211_v0  ;;  %1449 = vperm.xlu1 %2265, %v1399_v2   ;;  %v1400_v10 = vmul.f32 %v2348_v51, %v2285_v32  ;;  %v2287_v40 = vpop.eup %2286  ;;  %v1331_v0 = vadd.f32 1e-05, %v1259_v36 }
 0x251   : > { %1539 = vperm.xlu0 %2264, %v1417_v19   ;;  %v1418_v59 = vmul.f32 %v2349_v29, %v2287_v40  ;;  %v1332_v32 = vadd.f32 1e-05, %v1260_v62 }
 0x252   : > { %v1349_v35 = vadd.f32 1e-05, %v1277_v57  ;;  %v1151_v53 = vpop.xlane.xlu0 %1150 }
 0x253   : > { %v1147_v26 = vpop.xlane.xlu1 %1146 }
 0x254   : > { %2294 = vrsqrt.f32 %v1349_v35  ;;  %v1261_v3 = vmul.f32 0.0051020407, %v1147_v26  ;;  %1454 = vperm.xlu1 %2265, %v1400_v10   ;;  %v1278_v35 = vmul.f32 0.0051020407, %v1215_v4  ;;  %v2352_v4 = vld [vmem:[%s2512_s25 + $0x30] sm:$0xff] }
 0x255   : > { %2296 = vrsqrt.f32 %v1348_v45 }
 0x256   : > { %v2289_v16 = vpop.eup %2288  ;;  %v1333_v22 = vadd.f32 1e-05, %v1261_v3  ;;  %v1223_v2 = vpop.xlane.xlu0 %1222  ;;  %v2351_v3 = vld [vmem:[%s2512_s25 + $0x28] sm:$0xff] }
 0x257   : > { %v1219_v5 = vpop.xlane.xlu1 %1218  ;;  %v1419_v19 = vmul.f32 %v2350_v13, %v2289_v16  ;;  %v2291_v57 = vpop.eup %2290  ;;  %v1350_v16 = vadd.f32 1e-05, %v1278_v35 }
 0x258   : > { %2298 = vrsqrt.f32 %v1333_v22  ;;  %v1279_v48 = vmul.f32 0.0051020407, %v1219_v5  ;;  %1544 = vperm.xlu1 %2265, %v1418_v59   ;;  %v1401_v36 = vmul.f32 %v2351_v3, %v2291_v57  ;;  %v2293_v51 = vpop.eup %2292  ;;  %v1262_v22 = vmul.f32 0.0051020407, %v1151_v53  ;;  %v2354_v53 = vld [vmem:[%s2512_s25 + $0xc0] sm:$0xff]  ;;  %v2355_v3 = vld [vmem:[%s2512_s25 + $0x48] sm:$0xff] }
 0x259   : > { %1549 = vperm.xlu0 %2264, %v1419_v19   ;;  %2300 = vrsqrt.f32 %v1331_v0  ;;  %v2353_v0 = vld [vmem:[%s2512_s25 + $0xc8] sm:$0xff] }
 0x25a   : > { %v1351_v26 = vadd.f32 1e-05, %v1279_v48  ;;  %v1159_v31 = vpop.xlane.xlu0 %1158  ;;  %v1402_v48 = vmul.f32 %v2352_v4, %v2293_v51 }
 0x25b   : > { %v1155_v45 = vpop.xlane.xlu1 %1154 }
 0x25c   : > { %2302 = vrsqrt.f32 %v1351_v26  ;;  %v1263_v40 = vmul.f32 0.0051020407, %v1155_v45  ;;  %1459 = vperm.xlu1 %2265, %v1401_v36   ;;  %v1334_v26 = vadd.f32 1e-05, %v1262_v22 }
 0x25d   : > { %2304 = vrsqrt.f32 %v1332_v32  ;;  %v1280_v32 = vmul.f32 0.0051020407, %v1223_v2  ;;  %v2356_v2 = vld [vmem:[%s2512_s25 + $0x38] sm:$0xff] }
 0x25e   : > { %v2295_v10 = vpop.eup %2294  ;;  %v1335_v5 = vadd.f32 1e-05, %v1263_v40  ;;  %v1231_v29 = vpop.xlane.xlu0 %1230 }
 0x25f   : > { %v1227_v62 = vpop.xlane.xlu1 %1226  ;;  %v1421_v59 = vmul.f32 %v2353_v0, %v2295_v10  ;;  %v2297_v13 = vpop.eup %2296  ;;  %v2357_v0 = vld [vmem:[%s2512_s25 + $0xd8] sm:$0xff] }
 0x260   : > { %2306 = vrsqrt.f32 %v1335_v5  ;;  %v1281_v19 = vmul.f32 0.0051020407, %v1227_v62  ;;  %1464 = vperm.xlu1 %2265, %v1402_v48   ;;  %v1420_v45 = vmul.f32 %v2354_v53, %v2297_v13  ;;  %v1352_v62 = vadd.f32 1e-05, %v1280_v32 }
 0x261   : > { %1559 = vperm.xlu0 %2264, %v1421_v59   ;;  %2308 = vrsqrt.f32 %v1350_v16  ;;  %v1264_v16 = vmul.f32 0.0051020407, %v1159_v31  ;;  %v2358_v31 = vld [vmem:[%s2512_s25 + $0x40] sm:$0xff] }
 0x262   : > { %v2299_v57 = vpop.eup %2298  ;;  %v1353_v35 = vadd.f32 1e-05, %v1281_v19 }
 0x263   : > { %v1405_v36 = vmul.f32 %v2355_v3, %v2299_v57  ;;  %v2301_v40 = vpop.eup %2300  ;;  %v1163_v51 = vpop.xlane.xlu1 %1162  ;;  %v1336_v53 = vadd.f32 1e-05, %v1264_v16 }
 0x264   : > { %2310 = vrsqrt.f32 %v1353_v35  ;;  %v1167_v10 = vpop.xlane.xlu0 %1166  ;;  %v1265_v4 = vmul.f32 0.0051020407, %v1163_v51  ;;  %1554 = vperm.xlu1 %2265, %v1420_v45   ;;  %v1403_v48 = vmul.f32 %v2356_v2, %v2301_v40  ;;  %v1282_v45 = vmul.f32 0.0051020407, %v1231_v29  ;;  %v2360_v29 = vld [vmem:[%s2512_s25 + $0xd0] sm:$0xff] }
 0x265   : > { %1479 = vperm.xlu0 %2264, %v1405_v36   ;;  %2312 = vrsqrt.f32 %v1334_v26  ;;  %v2359_v36 = vld [vmem:[%s2512_s25 + $0x58] sm:$0xff]  ;;  %v1266_v2 = vmul.f32 0.0051020407, %v1167_v10 }
 0x266   : > { %v2303_v5 = vpop.eup %2302  ;;  %v1337_v22 = vadd.f32 1e-05, %v1265_v4 }
 0x267   : > { %v1423_v59 = vmul.f32 %v2357_v0, %v2303_v5  ;;  %v2305_v13 = vpop.eup %2304  ;;  %v1235_v19 = vpop.xlane.xlu1 %1234 }
 0x268   : > { %2314 = vrsqrt.f32 %v1337_v22  ;;  %v1283_v57 = vmul.f32 0.0051020407, %v1235_v19  ;;  %1469 = vperm.xlu1 %2265, %v1403_v48   ;;  %v1239_v26 = vpop.xlane.xlu0 %1238  ;;  %v1404_v3 = vmul.f32 %v2358_v31, %v2305_v13  ;;  %v1354_v22 = vadd.f32 1e-05, %v1282_v45  ;;  %v2361_v13 = vld [vmem:[%s2512_s25 + $0xe8] sm:$0xff]  ;;  %v2362_v45 = vld [vmem:[%s2512_s25 + $0x50] sm:$0xff] }
 0x269   : > { %1569 = vperm.xlu0 %2264, %v1423_v59   ;;  %2316 = vrsqrt.f32 %v1352_v62  ;;  %v1284_v31 = vmul.f32 0.0051020407, %v1239_v26 }
 0x26a   : > { %v2307_v35 = vpop.eup %2306  ;;  %v1355_v32 = vadd.f32 1e-05, %v1283_v57 }
 0x26b   : > { %v1407_v40 = vmul.f32 %v2359_v36, %v2307_v35  ;;  %v2309_v51 = vpop.eup %2308  ;;  %v1171_v4 = vpop.xlane.xlu1 %1170 }
 0x26c   : > { %2318 = vrsqrt.f32 %v1355_v32  ;;  %v1267_v5 = vmul.f32 0.0051020407, %v1171_v4  ;;  %1474 = vperm.xlu1 %2265, %v1404_v3   ;;  %v1422_v48 = vmul.f32 %v2360_v29, %v2309_v51  ;;  %v1175_v57 = vpop.xlane.xlu0 %1174  ;;  %v1338_v32 = vadd.f32 1e-05, %v1266_v2  ;;  %v2364_v2 = vld [vmem:[%s2512_s25 + $0xe0] sm:$0xff]  ;;  %v2365_v29 = vld [vmem:[%s2512_s25 + $0xf8] sm:$0xff] }
 0x26d   : > { %1489 = vperm.xlu0 %2264, %v1407_v40   ;;  %2320 = vrsqrt.f32 %v1336_v53  ;;  %v2363_v40 = vld [vmem:[%s2512_s25 + $0x68] sm:$0xff]  ;;  %v1356_v4 = vadd.f32 1e-05, %v1284_v31 }
 0x26e   : > { %v2311_v62 = vpop.eup %2310  ;;  %v1339_v16 = vadd.f32 1e-05, %v1267_v5  ;;  %v1268_v5 = vmul.f32 0.0051020407, %v1175_v57 }
 0x26f   : > { %v2313_v0 = vpop.eup %2312  ;;  %v1243_v59 = vpop.xlane.xlu1 %1242  ;;  %v1425_v19 = vmul.f32 %v2361_v13, %v2311_v62 }
 0x270   : > { %2322 = vrsqrt.f32 %v1339_v16  ;;  %v1285_v35 = vmul.f32 0.0051020407, %v1243_v59  ;;  %1564 = vperm.xlu1 %2265, %v1422_v48   ;;  %v1406_v3 = vmul.f32 %v2362_v45, %v2313_v0  ;;  %v1247_v26 = vpop.xlane.xlu0 %1246  ;;  %v1340_v0 = vadd.f32 1e-05, %v1268_v5  ;;  %v2368_v45 = vld [vmem:[%s2512_s25 + $0xf0] sm:$0xff] }
 0x271   : > { %2324 = vrsqrt.f32 %v1354_v22  ;;  %1579 = vperm.xlu0 %2264, %v1425_v19   ;;  %v1286_v59 = vmul.f32 0.0051020407, %v1247_v26  ;;  %v2366_v19 = vld [vmem:[%s2512_s25 + $0x60] sm:$0xff] }
 0x272   : > { %v2315_v10 = vpop.eup %2314  ;;  %v1357_v53 = vadd.f32 1e-05, %v1285_v35  ;;  %v2371_v26 = vld [vmem:[%s2512_s25 + $0x100] sm:$0xff] }
 0x273   : > { %v2317_v36 = vpop.eup %2316  ;;  %v1409_v51 = vmul.f32 %v2363_v40, %v2315_v10  ;;  %v1358_v10 = vadd.f32 1e-05, %v1286_v59  ;;  %v2369_v40 = vld [vmem:[%s2512_s25 + $0x108] sm:$0xff] }
 0x274   : > { %2326 = vrsqrt.f32 %v1357_v53  ;;  %1484 = vperm.xlu1 %2265, %v1406_v3   ;;  %v1424_v62 = vmul.f32 %v2364_v2, %v2317_v36 }
 0x275   : > { %2328 = vrsqrt.f32 %v1338_v32  ;;  %1499 = vperm.xlu0 %2264, %v1409_v51   ;;  %v2367_v32 = vld [vmem:[%s2512_s25 + $0x78] sm:$0xff] }
 0x276   : > { %v2319_v22 = vpop.eup %2318  ;;  %2330 = vrsqrt.f32 %v1356_v4  ;;  %v2370_v4 = vld [vmem:[%s2512_s25 + $0x70] sm:$0xff] }
 0x277   : > { %v2321_v16 = vpop.eup %2320  ;;  %v1427_v48 = vmul.f32 %v2365_v29, %v2319_v22  ;;  %2332 = vrsqrt.f32 %v1340_v0  ;;  %v1322_v0 = vld [vmem:[%s2512_s25 + $0x110] sm:$0xff] }
 0x278   : > { %1574 = vperm.xlu1 %2265, %v1424_v62   ;;  %v1408_v35 = vmul.f32 %v2366_v19, %v2321_v16  ;;  %2334 = vrsqrt.f32 %v1358_v10  ;;  %v2372_v16 = vld [vmem:[%s2512_s25 + $0x80] sm:$0xff]  ;;  %v3854_v19 = vmov 1  }
 0x279   : > { %1589 = vperm.xlu0 %2264, %v1427_v48  }
 0x27a   : > { %v2323_v13 = vpop.eup %2322 }
 0x27b   : > { %v2325_v57 = vpop.eup %2324  ;;  %v1411_v31 = vmul.f32 %v2367_v32, %v2323_v13  ;;  %v1323_v13 = vld [vmem:[%s2512_s25 + $0x118] sm:$0xff] }
 0x27c   : > { %1494 = vperm.xlu1 %2265, %v1408_v35   ;;  %v1426_v3 = vmul.f32 %v2368_v45, %v2325_v57 }
 0x27d   : > { %1509 = vperm.xlu0 %2264, %v1411_v31  }
 0x27e   : > { %v2327_v53 = vpop.eup %2326 }
 0x27f   : > { %v2329_v36 = vpop.eup %2328  ;;  %v1429_v51 = vmul.f32 %v2369_v40, %v2327_v53 }
 0x280   : > { %1584 = vperm.xlu1 %2265, %v1426_v3   ;;  %v1410_v5 = vmul.f32 %v2370_v4, %v2329_v36  ;;  %v2331_v22 = vpop.eup %2330  ;;  %v2373_v3 = vld [vmem:[%s2512_s25 + $0x88] sm:$0xff] }
 0x281   : > { %1599 = vperm.xlu0 %2264, %v1429_v51   ;;  %v1428_v2 = vmul.f32 %v2371_v26, %v2331_v22  ;;  %v2333_v62 = vpop.eup %2332  ;;  %v3855_v22 = vld [vmem:[#allocation56_spill] sm:$0xff] }
 0x282   : > { %v1412_v29 = vmul.f32 %v2372_v16, %v2333_v62  ;;  %v2335_v48 = vpop.eup %2334 }
 0x283   : > { %v1430_v59 = vmul.f32 %v2335_v48, %v1322_v0 }
 0x284   : > { %1504 = vperm.xlu1 %2265, %v1410_v5  }
 0x288   : > { %1594 = vperm.xlu1 %2265, %v1428_v2   ;;  %v3856_v2 = vld [vmem:[#allocation2_spill] sm:$0xff] }
 0x28c   : > { %1514 = vperm.xlu1 %2265, %v1412_v29  }
 0x290   : > { %1604 = vperm.xlu1 %2265, %v1430_v59  }
 0x294   : > { %2267 = vset.pattern.permute.xlu1 %v3854_v19 }
 0x295   : > { %1861 = vperm.xlu1 %2267, %v1323_v13  }
 0x29e   : > { %v1179_v35 = vpop.xlane.xlu1 %1178 }
 0x29f   : > { %v1269_v57 = vmul.f32 0.0051020407, %v1179_v35 }
 0x2a1   : > { %v1341_v32 = vadd.f32 1e-05, %v1269_v57  ;;  %v3858_v57 = vld [vmem:[#allocation58_spill] sm:$0xff] }
 0x2a2   : > { %v1251_v31 = vpop.xlane.xlu1 %1250 }
 0x2a3   : > { %2336 = vrsqrt.f32 %v1341_v32  ;;  %v1287_v10 = vmul.f32 0.0051020407, %v1251_v31  ;;  %v3859_v31 = vld [vmem:[#allocation11_spill] sm:$0xff] }
 0x2a5   : > { %v1359_v53 = vadd.f32 1e-05, %v1287_v10 }
 0x2a7   : > { %2338 = vrsqrt.f32 %v1359_v53 }
 0x2ad   : > { %v2337_v45 = vpop.eup %2336 }
 0x2ae   : > { %v1413_v36 = vmul.f32 %v2373_v3, %v2337_v45  ;;  %v3860_v3 = vld [vmem:[#allocation57_spill] sm:$0xff] }
 0x2b0   : > { %1519 = vperm.xlu0 %2264, %v1413_v36  }
 0x2b1   : > { %v2339_v40 = vpop.eup %2338 }
 0x2b2   : > { %v1431_v51 = vmul.f32 %v2339_v40, %v1323_v13 }
 0x2b4   : > { %1609 = vperm.xlu0 %2264, %v1431_v51   ;;  %v3862_v51 = vld [vmem:[#allocation60_spill] sm:$0xff] }
 0x2b8   : > { %2266 = vset.pattern.permute.xlu0 %v3854_v19 }
 0x2b9   : > { %1856 = vperm.xlu0 %2266, %v1322_v0   ;;  %v3857_v0 = vld [vmem:[#allocation42_spill] sm:$0xff] }
 0x2ba   : > { %v1435_v4 = vpop.permute.xlu0 %1434 }
 0x2bb   : > { %v1612_v5 = vmul.f32 %v1435_v4, %v2955_v38  ;;  %v1613_v26 = vmul.f32 %v1435_v4, %v3855_v22 }
 0x2bd   : > { %v1864_v62 = vadd.f32 %v3856_v2, %v1612_v5  ;;  %v1865_v16 = vadd.f32 %v3856_v2, %v1613_v26  ;;  %v3863_v5 = vld [vmem:[#allocation43_spill] sm:$0xff]  ;;  %v3864_v2 = vld [vmem:[#allocation6_spill] sm:$0xff] }
 0x2bf   : > { %v1525_v29 = vpop.permute.xlu1 %1524  ;;  %1936 = vst [vmem:[%s3398_s28] sm:$0xff] %v1864_v62  ;;  %1937 = vst.msk [vmem:[%s3398_s28 + $0x8] sm:$0xff] %vm783_vm1, %v1865_v16 }
 0x2c0   : > { %v1648_v38 = vmul.f32 %v1525_v29, %v2965_v52  ;;  %v1649_v48 = vmul.f32 %v1525_v29, %v2968_v55 }
 0x2c2   : > { %v1900_v59 = vadd.f32 %v3857_v0, %v1648_v38  ;;  %v1901_v13 = vadd.f32 %v3857_v0, %v1649_v48  ;;  %v3865_v48 = vld [vmem:[#allocation44_spill] sm:$0xff] }
 0x2c3   : > { %v1440_v19 = vpop.permute.xlu1 %1439 }
 0x2c4   : > { %1972 = vst [vmem:[%s3398_s28 + $0x120] sm:$0xff] %v1900_v59  ;;  %1973 = vst.msk [vmem:[%s3398_s28 + $0x128] sm:$0xff] %vm783_vm1, %v1901_v13  ;;  %v1614_v35 = vmul.f32 %v1440_v19, %v2979_v37  ;;  %v1615_v32 = vmul.f32 %v1440_v19, %v3858_v57  ;;  %v3861_v37 = vld [vmem:[#allocation59_spill] sm:$0xff] }
 0x2c6   : > { %v1866_v10 = vadd.f32 %v3859_v31, %v1614_v35  ;;  %v1867_v52 = vadd.f32 %v3859_v31, %v1615_v32  ;;  %v3867_v31 = vld [vmem:[#allocation45_spill] sm:$0xff] }
 0x2c7   : > { %v1445_v53 = vpop.permute.xlu1 %1444 }
 0x2c8   : > { %v1530_v55 = vpop.permute.xlu0 %1529  ;;  %1938 = vst [vmem:[%s3398_s28 + $0x10] sm:$0xff] %v1866_v10  ;;  %1939 = vst.msk [vmem:[%s3398_s28 + $0x18] sm:$0xff] %vm783_vm1, %v1867_v52  ;;  %v1616_v40 = vmul.f32 %v1445_v53, %v3861_v37  ;;  %v1617_v4 = vmul.f32 %v1445_v53, %v3862_v51 }
 0x2c9   : > { %v1650_v45 = vmul.f32 %v1530_v55, %v2991_v20  ;;  %v1651_v36 = vmul.f32 %v1530_v55, %v3860_v3  ;;  %v3868_v55 = vld [vmem:[#allocation16_spill] sm:$0xff] }
 0x2ca   : > { %v1868_v62 = vadd.f32 %v3864_v2, %v1616_v40  ;;  %v1869_v16 = vadd.f32 %v3864_v2, %v1617_v4 }
 0x2cb   : > { %v1902_v22 = vadd.f32 %v3863_v5, %v1650_v45  ;;  %v1903_v26 = vadd.f32 %v3863_v5, %v1651_v36  ;;  %v1535_v29 = vpop.permute.xlu1 %1534 }
 0x2cc   : > { %1940 = vst [vmem:[%s3398_s28 + $0x20] sm:$0xff] %v1868_v62  ;;  %1941 = vst.msk [vmem:[%s3398_s28 + $0x28] sm:$0xff] %vm783_vm1, %v1869_v16  ;;  %v1652_v20 = vmul.f32 %v1535_v29, %v3005_v60  ;;  %v1653_v38 = vmul.f32 %v1535_v29, %v3008_v43  ;;  %v3866_v43 = vld [vmem:[#allocation61_spill] sm:$0xff]  ;;  %v3871_v62 = vld [vmem:[#allocation46_spill] sm:$0xff] }
 0x2cd   : > { %1974 = vst [vmem:[%s3398_s28 + $0x130] sm:$0xff] %v1902_v22  ;;  %1975 = vst.msk [vmem:[%s3398_s28 + $0x138] sm:$0xff] %vm783_vm1, %v1903_v26  ;;  %v3870_v22 = vld [vmem:[#allocation47_spill] sm:$0xff] }
 0x2ce   : > { %v1904_v0 = vadd.f32 %v3865_v48, %v1652_v20  ;;  %v1905_v59 = vadd.f32 %v3865_v48, %v1653_v38 }
 0x2cf   : > { %v1450_v19 = vpop.permute.xlu1 %1449 }
 0x2d0   : > { %v1540_v13 = vpop.permute.xlu0 %1539  ;;  %1976 = vst [vmem:[%s3398_s28 + $0x140] sm:$0xff] %v1904_v0  ;;  %1977 = vst.msk [vmem:[%s3398_s28 + $0x148] sm:$0xff] %vm783_vm1, %v1905_v59  ;;  %v1618_v60 = vmul.f32 %v1450_v19, %v3019_v6  ;;  %v1619_v32 = vmul.f32 %v1450_v19, %v3866_v43  ;;  %v3873_v19 = vld [vmem:[#allocation49_spill] sm:$0xff] }
 0x2d1   : > { %v1654_v35 = vmul.f32 %v1540_v13, %v3040_v12  ;;  %v1655_v57 = vmul.f32 %v1540_v13, %v3028_v21  ;;  %v3869_v21 = vld [vmem:[#allocation21_spill] sm:$0xff] }
 0x2d2   : > { %v1870_v53 = vadd.f32 %v3868_v55, %v1618_v60  ;;  %v1871_v45 = vadd.f32 %v3868_v55, %v1619_v32  ;;  %v3874_v60 = vld [vmem:[#allocation30_spill] sm:$0xff] }
 0x2d3   : > { %v1906_v10 = vadd.f32 %v3867_v31, %v1654_v35  ;;  %v1907_v52 = vadd.f32 %v3867_v31, %v1655_v57  ;;  %v1455_v3 = vpop.permute.xlu1 %1454 }
 0x2d4   : > { %1942 = vst [vmem:[%s3398_s28 + $0x30] sm:$0xff] %v1870_v53  ;;  %1943 = vst.msk [vmem:[%s3398_s28 + $0x38] sm:$0xff] %vm783_vm1, %v1871_v45  ;;  %v1620_v12 = vmul.f32 %v1455_v3, %v3031_v15  ;;  %v1621_v6 = vmul.f32 %v1455_v3, %v3034_v23  ;;  %v3876_v45 = vld [vmem:[#allocation48_spill] sm:$0xff] }
 0x2d5   : > { %1978 = vst [vmem:[%s3398_s28 + $0x150] sm:$0xff] %v1906_v10  ;;  %1979 = vst.msk [vmem:[%s3398_s28 + $0x158] sm:$0xff] %vm783_vm1, %v1907_v52  ;;  %v3875_v52 = vld [vmem:[#allocation33_spill] sm:$0xff] }
 0x2d6   : > { %v1872_v36 = vadd.f32 %v3869_v21, %v1620_v12  ;;  %v1873_v37 = vadd.f32 %v3869_v21, %v1621_v6 }
 0x2d7   : > { %v1545_v51 = vpop.permute.xlu1 %1544 }
 0x2d8   : > { %v1550_v40 = vpop.permute.xlu0 %1549  ;;  %1944 = vst [vmem:[%s3398_s28 + $0x40] sm:$0xff] %v1872_v36  ;;  %1945 = vst.msk [vmem:[%s3398_s28 + $0x48] sm:$0xff] %vm783_vm1, %v1873_v37  ;;  %v1656_v15 = vmul.f32 %v1545_v51, %v3048_v11  ;;  %v1657_v23 = vmul.f32 %v1545_v51, %v3051_v17  ;;  %v3877_v36 = vld [vmem:[#allocation51_spill] sm:$0xff] }
 0x2d9   : > { %v1658_v4 = vmul.f32 %v1550_v40, %v3087_v27  ;;  %v1659_v5 = vmul.f32 %v1550_v40, %v3071_v8  ;;  %v3872_v8 = vld [vmem:[#allocation26_spill] sm:$0xff]  ;;  %v3878_v51 = vld [vmem:[#allocation31_spill] sm:$0xff] }
 0x2da   : > { %v1908_v16 = vadd.f32 %v3871_v62, %v1656_v15  ;;  %v1909_v29 = vadd.f32 %v3871_v62, %v1657_v23  ;;  %v3880_v62 = vld [vmem:[#allocation32_spill] sm:$0xff] }
 0x2db   : > { %v1910_v26 = vadd.f32 %v3870_v22, %v1658_v4  ;;  %v1911_v2 = vadd.f32 %v3870_v22, %v1659_v5  ;;  %v1460_v20 = vpop.permute.xlu1 %1459  ;;  %v3879_v22 = vld [vmem:[#allocation35_spill] sm:$0xff] }
 0x2dc   : > { %1980 = vst [vmem:[%s3398_s28 + $0x160] sm:$0xff] %v1908_v16  ;;  %1981 = vst.msk [vmem:[%s3398_s28 + $0x168] sm:$0xff] %vm783_vm1, %v1909_v29  ;;  %v1622_v11 = vmul.f32 %v1460_v20, %v3059_v24  ;;  %v1623_v17 = vmul.f32 %v1460_v20, %v3054_v63 }
 0x2dd   : > { %1982 = vst [vmem:[%s3398_s28 + $0x170] sm:$0xff] %v1910_v26  ;;  %1983 = vst.msk [vmem:[%s3398_s28 + $0x178] sm:$0xff] %vm783_vm1, %v1911_v2 }
 0x2de   : > { %v1874_v27 = vadd.f32 %v3872_v8, %v1622_v11  ;;  %v1875_v38 = vadd.f32 %v3872_v8, %v1623_v17  ;;  %v3881_v17 = vld [vmem:[#allocation50_spill] sm:$0xff] }
 0x2df   : > { %v1465_v0 = vpop.permute.xlu1 %1464 }
 0x2e0   : > { %v1560_v48 = vpop.permute.xlu0 %1559  ;;  %1946 = vst [vmem:[%s3398_s28 + $0x50] sm:$0xff] %v1874_v27  ;;  %1947 = vst.msk [vmem:[%s3398_s28 + $0x58] sm:$0xff] %vm783_vm1, %v1875_v38  ;;  %v1624_v24 = vmul.f32 %v1465_v0, %v3074_v54  ;;  %v1625_v63 = vmul.f32 %v1465_v0, %v3077_v9  ;;  %v3882_v38 = vld [vmem:[#allocation53_spill] sm:$0xff] }
 0x2e1   : > { %v1662_v59 = vmul.f32 %v1560_v48, %v3125_v33  ;;  %v1663_v13 = vmul.f32 %v1560_v48, %v3114_v56 }
 0x2e2   : > { %v1876_v43 = vadd.f32 %v3874_v60, %v1624_v24  ;;  %v1877_v32 = vadd.f32 %v3874_v60, %v1625_v63  ;;  %v3885_v24 = vld [vmem:[#allocation9_spill] sm:$0xff] }
 0x2e3   : > { %v1914_v35 = vadd.f32 %v3873_v19, %v1662_v59  ;;  %v1915_v57 = vadd.f32 %v3873_v19, %v1663_v13  ;;  %v1555_v10 = vpop.permute.xlu1 %1554  ;;  %v3886_v19 = vld [vmem:[#allocation5_spill] sm:$0xff] }
 0x2e4   : > { %v1480_v31 = vpop.permute.xlu0 %1479  ;;  %1948 = vst [vmem:[%s3398_s28 + $0x60] sm:$0xff] %v1876_v43  ;;  %1949 = vst.msk [vmem:[%s3398_s28 + $0x68] sm:$0xff] %vm783_vm1, %v1877_v32  ;;  %v1660_v56 = vmul.f32 %v1555_v10, %v3094_v49  ;;  %v1661_v33 = vmul.f32 %v1555_v10, %v3097_v18  ;;  %v3888_v32 = vld [vmem:[#allocation37_spill] sm:$0xff] }
 0x2e5   : > { %1986 = vst [vmem:[%s3398_s28 + $0x190] sm:$0xff] %v1914_v35  ;;  %1987 = vst.msk [vmem:[%s3398_s28 + $0x198] sm:$0xff] %vm783_vm1, %v1915_v57  ;;  %v1630_v54 = vmul.f32 %v1480_v31, %v3153_v25  ;;  %v1631_v9 = vmul.f32 %v1480_v31, %v3143_v34  ;;  %v3887_v57 = vld [vmem:[#allocation34_spill] sm:$0xff] }
 0x2e6   : > { %v1912_v3 = vadd.f32 %v3876_v45, %v1660_v56  ;;  %v1913_v12 = vadd.f32 %v3876_v45, %v1661_v33  ;;  %v3889_v56 = vld [vmem:[#allocation64_spill] sm:$0xff]  ;;  %v3891_v45 = vld [vmem:[#allocation7_spill] sm:$0xff] }
 0x2e7   : > { %v1882_v55 = vadd.f32 %v3875_v52, %v1630_v54  ;;  %v1883_v53 = vadd.f32 %v3875_v52, %v1631_v9  ;;  %v1470_v21 = vpop.permute.xlu1 %1469  ;;  %v3890_v52 = vld [vmem:[#allocation65_spill] sm:$0xff] }
 0x2e8   : > { %v1570_v6 = vpop.permute.xlu0 %1569  ;;  %1984 = vst [vmem:[%s3398_s28 + $0x180] sm:$0xff] %v1912_v3  ;;  %1985 = vst.msk [vmem:[%s3398_s28 + $0x188] sm:$0xff] %vm783_vm1, %v1913_v12  ;;  %v1626_v34 = vmul.f32 %v1470_v21, %v3106_v41  ;;  %v1627_v25 = vmul.f32 %v1470_v21, %v3100_v42  ;;  %v3892_v12 = vld [vmem:[#allocation52_spill] sm:$0xff] }
 0x2e9   : > { %1954 = vst [vmem:[%s3398_s28 + $0x90] sm:$0xff] %v1882_v55  ;;  %1955 = vst.msk [vmem:[%s3398_s28 + $0x98] sm:$0xff] %vm783_vm1, %v1883_v53  ;;  %v1666_v49 = vmul.f32 %v1570_v6, %v3172_v44  ;;  %v1667_v18 = vmul.f32 %v1570_v6, %v3160_v14 }
 0x2ea   : > { %v1878_v4 = vadd.f32 %v3878_v51, %v1626_v34  ;;  %v1879_v5 = vadd.f32 %v3878_v51, %v1627_v25 }
 0x2eb   : > { %v1918_v37 = vadd.f32 %v3877_v36, %v1666_v49  ;;  %v1919_v40 = vadd.f32 %v3877_v36, %v1667_v18  ;;  %v1475_v23 = vpop.permute.xlu1 %1474  ;;  %v3893_v49 = vld [vmem:[#allocation55_spill] sm:$0xff] }
 0x2ec   : > { %v1490_v15 = vpop.permute.xlu0 %1489  ;;  %1950 = vst [vmem:[%s3398_s28 + $0x70] sm:$0xff] %v1878_v4  ;;  %1951 = vst.msk [vmem:[%s3398_s28 + $0x78] sm:$0xff] %vm783_vm1, %v1879_v5  ;;  %v1628_v14 = vmul.f32 %v1475_v23, %v3117_v7  ;;  %v1629_v44 = vmul.f32 %v1475_v23, %v3120_v50  ;;  %v3896_v5 = vld [vmem:[#allocation13_spill] sm:$0xff]  ;;  %v3897_v23 = vld [vmem:[#allocation36_spill] sm:$0xff] }
 0x2ed   : > { %1990 = vst [vmem:[%s3398_s28 + $0x1b0] sm:$0xff] %v1918_v37  ;;  %1991 = vst.msk [vmem:[%s3398_s28 + $0x1b8] sm:$0xff] %vm783_vm1, %v1919_v40  ;;  %v1634_v42 = vmul.f32 %v1490_v15, %v3191_v58  ;;  %v1635_v41 = vmul.f32 %v1490_v15, %v3186_v30  ;;  %v3894_v37 = vld [vmem:[#allocation66_spill] sm:$0xff] }
 0x2ee   : > { %v1880_v16 = vadd.f32 %v3880_v62, %v1628_v14  ;;  %v1881_v29 = vadd.f32 %v3880_v62, %v1629_v44  ;;  %v3898_v14 = vld [vmem:[#allocation39_spill] sm:$0xff] }
 0x2ef   : > { %v1886_v26 = vadd.f32 %v3879_v22, %v1634_v42  ;;  %v1887_v2 = vadd.f32 %v3879_v22, %v1635_v41  ;;  %v1565_v20 = vpop.permute.xlu1 %1564  ;;  %v3899_v62 = vld [vmem:[#allocation3_spill] sm:$0xff] }
 0x2f0   : > { %1952 = vst [vmem:[%s3398_s28 + $0x80] sm:$0xff] %v1880_v16  ;;  %1953 = vst.msk [vmem:[%s3398_s28 + $0x88] sm:$0xff] %vm783_vm1, %v1881_v29  ;;  %v1580_v7 = vpop.permute.xlu0 %1579  ;;  %v1664_v50 = vmul.f32 %v1565_v20, %v3137_v47  ;;  %v1665_v30 = vmul.f32 %v1565_v20, %v3140_v61  ;;  %v3883_v61 = vld [vmem:[#allocation62_spill] sm:$0xff]  ;;  %v3900_v16 = vld [vmem:[#allocation4_spill] sm:$0xff] }
 0x2f1   : > { %1958 = vst [vmem:[%s3398_s28 + $0xb0] sm:$0xff] %v1886_v26  ;;  %1959 = vst.msk [vmem:[%s3398_s28 + $0xb8] sm:$0xff] %vm783_vm1, %v1887_v2  ;;  %v1670_v58 = vmul.f32 %v1580_v7, %v3213_v46  ;;  %v1671_v11 = vmul.f32 %v1580_v7, %v3203_v1  ;;  %v3884_v46 = vld [vmem:[#allocation63_spill] sm:$0xff]  ;;  %v3901_v20 = vld [vmem:[#allocation20_spill] sm:$0xff] }
 0x2f2   : > { %v1916_v8 = vadd.f32 %v3881_v17, %v1664_v50  ;;  %v1917_v27 = vadd.f32 %v3881_v17, %v1665_v30  ;;  %v3902_v50 = vld [vmem:[#allocation15_spill] sm:$0xff] }
 0x2f3   : > { %v1922_v48 = vadd.f32 %v3882_v38, %v1670_v58  ;;  %v1923_v0 = vadd.f32 %v3882_v38, %v1671_v11  ;;  %v1485_v59 = vpop.permute.xlu1 %1484  ;;  %v3903_v58 = vld [vmem:[#allocation54_spill] sm:$0xff] }
 0x2f4   : > { %1988 = vst [vmem:[%s3398_s28 + $0x1a0] sm:$0xff] %v1916_v8  ;;  %1989 = vst.msk [vmem:[%s3398_s28 + $0x1a8] sm:$0xff] %vm783_vm1, %v1917_v27  ;;  %v1500_v47 = vpop.permute.xlu0 %1499  ;;  %v1632_v13 = vmul.f32 %v1485_v59, %v3883_v61  ;;  %v1633_v1 = vmul.f32 %v1485_v59, %v3884_v46  ;;  %v3904_v8 = vld [vmem:[#allocation18_spill] sm:$0xff] }
 0x2f5   : > { %1994 = vst [vmem:[%s3398_s28 + $0x1d0] sm:$0xff] %v1922_v48  ;;  %1995 = vst.msk [vmem:[%s3398_s28 + $0x1d8] sm:$0xff] %vm783_vm1, %v1923_v0  ;;  %v1638_v63 = vmul.f32 %v1500_v47, %v3885_v24  ;;  %v1639_v35 = vmul.f32 %v1500_v47, %v3886_v19  ;;  %v3905_v0 = vld [vmem:[#allocation10_spill] sm:$0xff]  ;;  %v3906_v47 = vld [vmem:[#allocation12_spill] sm:$0xff] }
 0x2f6   : > { %v1884_v60 = vadd.f32 %v3887_v57, %v1632_v13  ;;  %v1885_v43 = vadd.f32 %v3887_v57, %v1633_v1  ;;  %v3907_v13 = vld [vmem:[#allocation38_spill] sm:$0xff] }
 0x2f7   : > { %v1890_v31 = vadd.f32 %v3888_v32, %v1638_v63  ;;  %v1891_v10 = vadd.f32 %v3888_v32, %v1639_v35  ;;  %v1575_v54 = vpop.permute.xlu1 %1574  ;;  %v3908_v63 = vld [vmem:[#allocation14_spill] sm:$0xff]  ;;  %v3909_v35 = vld [vmem:[#allocation8_spill] sm:$0xff] }
 0x2f8   : > { %1956 = vst [vmem:[%s3398_s28 + $0xa0] sm:$0xff] %v1884_v60  ;;  %1957 = vst.msk [vmem:[%s3398_s28 + $0xa8] sm:$0xff] %vm783_vm1, %v1885_v43  ;;  %v1590_v9 = vpop.permute.xlu0 %1589  ;;  %v1668_v33 = vmul.f32 %v1575_v54, %v3889_v56  ;;  %v1669_v55 = vmul.f32 %v1575_v54, %v3890_v52  ;;  %v3910_v60 = vld [vmem:[#allocation29_spill] sm:$0xff] }
 0x2f9   : > { %1962 = vst [vmem:[%s3398_s28 + $0xd0] sm:$0xff] %v1890_v31  ;;  %1963 = vst.msk [vmem:[%s3398_s28 + $0xd8] sm:$0xff] %vm783_vm1, %v1891_v10  ;;  %v1674_v53 = vmul.f32 %v1590_v9, %v3264_v28  ;;  %v1675_v3 = vmul.f32 %v1590_v9, %v3891_v45  ;;  %v3895_v28 = vld [vmem:[#allocation67_spill] sm:$0xff]  ;;  %v3912_v9 = vld [vmem:[#allocation17_spill] sm:$0xff] }
 0x2fa   : > { %v1920_v6 = vadd.f32 %v3892_v12, %v1668_v33  ;;  %v1921_v21 = vadd.f32 %v3892_v12, %v1669_v55  ;;  %v3911_v10 = vld [vmem:[#allocation19_spill] sm:$0xff]  ;;  %v3913_v33 = vld [vmem:[#allocation40_spill] sm:$0xff] }
 0x2fb   : > { %v1926_v18 = vadd.f32 %v3893_v49, %v1674_v53  ;;  %v1927_v34 = vadd.f32 %v3893_v49, %v1675_v3  ;;  %v1495_v25 = vpop.permute.xlu1 %1494  ;;  %v3914_v3 = vld [vmem:[#allocation23_spill] sm:$0xff]  ;;  %v3916_v49 = vld [vmem:[#allocation41_spill] sm:$0xff] }
 0x2fc   : > { %1992 = vst [vmem:[%s3398_s28 + $0x1c0] sm:$0xff] %v1920_v6  ;;  %1993 = vst.msk [vmem:[%s3398_s28 + $0x1c8] sm:$0xff] %vm783_vm1, %v1921_v21  ;;  %v1510_v36 = vpop.permute.xlu0 %1509  ;;  %v1636_v40 = vmul.f32 %v1495_v25, %v3894_v37  ;;  %v1637_v51 = vmul.f32 %v1495_v25, %v3895_v28  ;;  %v3915_v6 = vld [vmem:[#allocation25_spill] sm:$0xff]  ;;  %v3917_v37 = vld [vmem:[#allocation27_spill] sm:$0xff] }
 0x2fd   : > { %1998 = vst [vmem:[%s3398_s28 + $0x1f0] sm:$0xff] %v1926_v18  ;;  %1999 = vst.msk [vmem:[%s3398_s28 + $0x1f8] sm:$0xff] %vm783_vm1, %v1927_v34  ;;  %v1642_v4 = vmul.f32 %v1510_v36, %v3284_v39  ;;  %v1643_v15 = vmul.f32 %v1510_v36, %v3896_v5  ;;  %v3918_v28 = vld [vmem:[#allocation28_spill] sm:$0xff] }
 0x2fe   : > { %v1888_v42 = vadd.f32 %v3897_v23, %v1636_v40  ;;  %v1889_v41 = vadd.f32 %v3897_v23, %v1637_v51 }
 0x2ff   : > { %v1894_v44 = vadd.f32 %v3898_v14, %v1642_v4  ;;  %v1895_v22 = vadd.f32 %v3898_v14, %v1643_v15  ;;  %v1585_v26 = vpop.permute.xlu1 %1584  ;;  %v3919_v15 = vld [vmem:[#allocation22_spill] sm:$0xff] }
 0x300   : > { %1960 = vst [vmem:[%s3398_s28 + $0xc0] sm:$0xff] %v1888_v42  ;;  %1961 = vst.msk [vmem:[%s3398_s28 + $0xc8] sm:$0xff] %vm783_vm1, %v1889_v41  ;;  %v1600_v2 = vpop.permute.xlu0 %1599  ;;  %v1672_v39 = vmul.f32 %v1585_v26, %v3899_v62  ;;  %v1673_v29 = vmul.f32 %v1585_v26, %v3900_v16  ;;  %v3920_v42 = vld [vmem:[#allocation24_spill] sm:$0xff] }
 0x301   : > { %1966 = vst [vmem:[%s3398_s28 + $0xf0] sm:$0xff] %v1894_v44  ;;  %1967 = vst.msk [vmem:[%s3398_s28 + $0xf8] sm:$0xff] %vm783_vm1, %v1895_v22  ;;  %v1678_v7 = vmul.f32 %v1600_v2, %v3901_v20  ;;  %v1679_v30 = vmul.f32 %v1600_v2, %v3902_v50 }
 0x302   : > { %v1924_v11 = vadd.f32 %v3903_v58, %v1672_v39  ;;  %v1925_v17 = vadd.f32 %v3903_v58, %v1673_v29 }
 0x303   : > { %v1930_v27 = vadd.f32 %v3904_v8, %v1678_v7  ;;  %v1931_v38 = vadd.f32 %v3904_v8, %v1679_v30  ;;  %v1505_v48 = vpop.permute.xlu1 %1504 }
 0x304   : > { %1996 = vst [vmem:[%s3398_s28 + $0x1e0] sm:$0xff] %v1924_v11  ;;  %1997 = vst.msk [vmem:[%s3398_s28 + $0x1e8] sm:$0xff] %vm783_vm1, %v1925_v17  ;;  %v1640_v59 = vmul.f32 %v1505_v48, %v3905_v0  ;;  %v1641_v61 = vmul.f32 %v1505_v48, %v3906_v47 }
 0x305   : > { %2002 = vst [vmem:[%s3398_s28 + $0x210] sm:$0xff] %v1930_v27  ;;  %2003 = vst.msk [vmem:[%s3398_s28 + $0x218] sm:$0xff] %vm783_vm1, %v1931_v38 }
 0x306   : > { %v1892_v46 = vadd.f32 %v3907_v13, %v1640_v59  ;;  %v1893_v1 = vadd.f32 %v3907_v13, %v1641_v61 }
 0x307   : > { %v1595_v24 = vpop.permute.xlu1 %1594 }
 0x308   : > { %1964 = vst [vmem:[%s3398_s28 + $0xe0] sm:$0xff] %v1892_v46  ;;  %1965 = vst.msk [vmem:[%s3398_s28 + $0xe8] sm:$0xff] %vm783_vm1, %v1893_v1  ;;  %v1676_v19 = vmul.f32 %v1595_v24, %v3908_v63  ;;  %v1677_v57 = vmul.f32 %v1595_v24, %v3909_v35 }
 0x30a   : > { %v1928_v43 = vadd.f32 %v3910_v60, %v1676_v19  ;;  %v1929_v32 = vadd.f32 %v3910_v60, %v1677_v57 }
 0x30b   : > { %v1515_v31 = vpop.permute.xlu1 %1514 }
 0x30c   : > { %2000 = vst [vmem:[%s3398_s28 + $0x200] sm:$0xff] %v1928_v43  ;;  %2001 = vst.msk [vmem:[%s3398_s28 + $0x208] sm:$0xff] %vm783_vm1, %v1929_v32  ;;  %v1644_v54 = vmul.f32 %v1515_v31, %v3911_v10  ;;  %v1645_v56 = vmul.f32 %v1515_v31, %v3912_v9 }
 0x30e   : > { %v1896_v52 = vadd.f32 %v3913_v33, %v1644_v54  ;;  %v1897_v55 = vadd.f32 %v3913_v33, %v1645_v56 }
 0x30f   : > { %v1605_v53 = vpop.permute.xlu1 %1604 }
 0x310   : > { %1968 = vst [vmem:[%s3398_s28 + $0x100] sm:$0xff] %v1896_v52  ;;  %1969 = vst.msk [vmem:[%s3398_s28 + $0x108] sm:$0xff] %vm783_vm1, %v1897_v55  ;;  %v1680_v23 = vmul.f32 %v1605_v53, %v3919_v15  ;;  %v1681_v41 = vmul.f32 %v1605_v53, %v3920_v42 }
 0x314   : > { %v1862_v36 = vpop.permute.xlu1 %1861 }
 0x32f   : > { %v1520_v45 = vpop.permute.xlu0 %1519 }
 0x330   : > { %v1646_v12 = vmul.f32 %v1520_v45, %v3914_v3  ;;  %v1647_v21 = vmul.f32 %v1520_v45, %v3915_v6 }
 0x332   : > { %v1898_v18 = vadd.f32 %v3916_v49, %v1646_v12  ;;  %v1899_v34 = vadd.f32 %v3916_v49, %v1647_v21 }
 0x333   : > { %v1610_v25 = vpop.permute.xlu0 %1609 }
 0x334   : > { %1970 = vst [vmem:[%s3398_s28 + $0x110] sm:$0xff] %v1898_v18  ;;  %1971 = vst.msk [vmem:[%s3398_s28 + $0x118] sm:$0xff] %vm783_vm1, %v1899_v34  ;;  %v1682_v40 = vmul.f32 %v1610_v25, %v3917_v37  ;;  %v1683_v51 = vmul.f32 %v1610_v25, %v3918_v28 }
 0x336   : > { %v1934_v4 = vadd.f32 %v1862_v36, %v1682_v40  ;;  %v1935_v5 = vadd.f32 %v1862_v36, %v1683_v51 }
 0x338   : > { %2006 = vst [vmem:[%s3398_s28 + $0x230] sm:$0xff] %v1934_v4  ;;  %2007 = vst.msk [vmem:[%s3398_s28 + $0x238] sm:$0xff] %vm783_vm1, %v1935_v5  ;;  %v1857_v14 = vpop.permute.xlu0 %1856 }
 0x339   : > { %v1932_v44 = vadd.f32 %v1857_v14, %v1680_v23  ;;  %v1933_v22 = vadd.f32 %v1857_v14, %v1681_v41 }
 0x33b   : > { %2004 = vst [vmem:[%s3398_s28 + $0x220] sm:$0xff] %v1932_v44  ;;  %2005 = vst.msk [vmem:[%s3398_s28 + $0x228] sm:$0xff] %vm783_vm1, %v1933_v22 }
 0x33c PF: > { %s14_s15 = sadd.s32 1, %s2380_s15  }
 0x33d   : > { %p11_p4 = scmp.ge.s32.totalorder %s14_s15, 4  }
 0x33f   :  { %13 = sbr.rel (!%p11_p4) target bundleno = 1 (0x1), region = 69 }

</bundles_post_ra>
